<compile_context>
chip_gen: v5e
topology: v5e:2x2
jax: 0.10.0
libtpu: 0.0.40
codegen_flags: <defaults>
</compile_context>

<pallas_src>
from functools import partial

import jax
import jax.numpy as jnp
from jax.experimental import pallas as pl
from jax.experimental.pallas import tpu as pltpu

_LANE = 128


def _round_up(n, m):
    return (n + m - 1) // m * m


def _mlp_kernel(x_ref, w1_ref, shift_ref, w2_ref, b2_ref, o_ref):
    # Hidden layer: (bf16 x) @ (bf16 W1*bn_scale) -> f32 accumulate, + folded BN shift, ReLU.
    h = jnp.dot(x_ref[...], w1_ref[...], preferred_element_type=jnp.float32)
    h = jnp.maximum(h + shift_ref[...], 0.0)
    # Output layer: single bf16 MXU pass with f32 accumulate + f32 bias (1/T folded in).
    out = jnp.dot(h.astype(jnp.bfloat16), w2_ref[...],
                  preferred_element_type=jnp.float32) + b2_ref[...]
    o_ref[...] = out.astype(o_ref.dtype)


@partial(jax.jit, static_argnames=("temperature", "eps", "tile_b", "out_dtype"))
def mlp_classifier(x, w1, gamma, beta, running_mean, running_var, w2, b2,
                   *, temperature=1.0, eps=1e-5, tile_b=1024, out_dtype=jnp.float32):
    """Fused MLP head (eval-mode BatchNorm).

    x:  (B, C0) f32
    w1: (C1, C0)   PyTorch Linear(C0, C1, bias=False).weight
    gamma/beta/running_mean/running_var: (C1,)  BatchNorm1d(C1) eval-mode params
    w2: (C2, C1)   PyTorch Linear(C1, C2).weight
    b2: (C2,)      PyTorch Linear(C1, C2).bias
    returns (B, C2) f32
    """
    B, C0 = x.shape
    C1 = w1.shape[0]
    C2 = w2.shape[0]

    # --- Host-side folding (fused under jit) --------------------------------
    scale = gamma / jnp.sqrt(running_var + eps)           # (C1,)
    shift = beta - running_mean * scale                   # (C1,)
    w1_bf = (w1 * scale[:, None]).T.astype(jnp.bfloat16)  # (C0, C1), BN scale folded in
    inv_t = jnp.float32(1.0 / float(temperature))

    # Lane-dense output: pad C2 up to a multiple of 128 (sliced off afterwards).
    C2p = _round_up(max(C2, _LANE), _LANE)
    w2_bf = jnp.pad(w2.T * inv_t, ((0, 0), (0, C2p - C2))).astype(jnp.bfloat16)
    b2_s = jnp.pad(b2 * inv_t, (0, C2p - C2))

    # Batch tiling (16-row granularity: bf16 packs 16 rows per sublane group).
    tb = tile_b if B >= tile_b else _round_up(B, 16)
    Bp = _round_up(B, tb)

    # One host-side pass over x: cast to bf16 first; pad only when needed.
    x_bf = x.astype(jnp.bfloat16)
    if Bp != B:
        x_bf = jnp.pad(x_bf, ((0, Bp - B), (0, 0)))

    # Double-buffered VMEM footprint estimate; raise the scoped limit only when a
    # caller-supplied tile would exceed v5e's 16 MiB default (v6e/v7x default 32 MiB).
    out_bytes = jnp.dtype(out_dtype).itemsize
    vmem_bytes = 2 * (tb * C0 * 2 + tb * C2p * out_bytes
                      + C0 * C1 * 2 + C1 * C2p * 2 + (C1 + C2p) * 4)
    cp = dict(dimension_semantics=("parallel",))   # megacore-shards the batch grid on v7x
    if vmem_bytes > (14 << 20):
        cp["vmem_limit_bytes"] = int(min(vmem_bytes + (4 << 20), 48 << 20))

    out = pl.pallas_call(
        _mlp_kernel,
        out_shape=jax.ShapeDtypeStruct((Bp, C2p), out_dtype),
        grid=(Bp // tb,),
        in_specs=[
            pl.BlockSpec((tb, C0), lambda i: (i, 0)),     # x tile (bf16, pipelined)
            pl.BlockSpec((C0, C1), lambda i: (0, 0)),     # bf16 W1*bn_scale (resident)
            pl.BlockSpec((1, C1), lambda i: (0, 0)),      # folded BN shift (f32)
            pl.BlockSpec((C1, C2p), lambda i: (0, 0)),    # bf16 W2/temperature (resident)
            pl.BlockSpec((1, C2p), lambda i: (0, 0)),     # b2/temperature (f32)
        ],
        out_specs=pl.BlockSpec((tb, C2p), lambda i: (i, 0)),
        compiler_params=pltpu.CompilerParams(**cp),
    )(x_bf, w1_bf, shift[None, :], w2_bf, b2_s[None, :])

    return out[:B, :C2].astype(jnp.float32)


def _reference_f32(x, w1, gamma, beta, running_mean, running_var, w2, b2,
                   temperature, eps=1e-5):
    """Pure f32 eval-mode reference matching the PyTorch module."""
    h = x @ w1.T
    h = (h - running_mean) / jnp.sqrt(running_var + eps) * gamma + beta
    h = jnp.maximum(h, 0.0)
    return (h @ w2.T + b2) / temperature


def _reference_bf16(x, w1, gamma, beta, running_mean, running_var, w2, b2,
                    temperature, eps=1e-5):
    """Reference with the same bf16 casts / folding as the kernel."""
    scale = gamma / jnp.sqrt(running_var + eps)
    shift = beta - running_mean * scale
    inv_t = 1.0 / temperature
    xb = x.astype(jnp.bfloat16).astype(jnp.float32)
    wb = ((w1 * scale[:, None]).T).astype(jnp.bfloat16).astype(jnp.float32)
    h = jnp.maximum(xb @ wb + shift, 0.0)
    hb = h.astype(jnp.bfloat16).astype(jnp.float32)
    w2b = (w2.T * inv_t).astype(jnp.bfloat16).astype(jnp.float32)
    return hb @ w2b + b2 * inv_t


if __name__ == "__main__":
    # Module defaults: channels = (2048, 256, 12), temperature = 1.0
    C0, C1, C2 = 2048, 256, 12
    temperature = 1.0
    eps = 1e-5

    key = jax.random.PRNGKey(0)
    kx, kw1, kw2, kb2, kg, kb, km, kv, kx2 = jax.random.split(key, 9)

    # Deterministic parameters (PyTorch shapes).
    w1 = jax.random.normal(kw1, (C1, C0), dtype=jnp.float32) * 0.02   # Linear(C0,C1,bias=False).weight
    w2 = jax.random.normal(kw2, (C2, C1), dtype=jnp.float32) * 0.02   # Linear(C1,C2).weight
    b2 = jax.random.normal(kb2, (C2,), dtype=jnp.float32) * 0.01      # Linear(C1,C2).bias
    gamma = 1.0 + 0.1 * jax.random.normal(kg, (C1,), dtype=jnp.float32)
    beta = 0.1 * jax.random.normal(kb, (C1,), dtype=jnp.float32)
    running_mean = 0.1 * jax.random.normal(km, (C1,), dtype=jnp.float32)
    running_var = jnp.abs(jax.random.normal(kv, (C1,), dtype=jnp.float32)) + 0.5

    def check(x, tile_b):
        out = mlp_classifier(x, w1, gamma, beta, running_mean, running_var, w2, b2,
                             temperature=temperature, eps=eps, tile_b=tile_b)
        out = jax.block_until_ready(out)
        assert out.shape == (x.shape[0], C2)
        # Exact-ish check (same bf16 casts as the kernel).
        ref_bf = _reference_bf16(x, w1, gamma, beta, running_mean, running_var,
                                 w2, b2, temperature, eps)
        assert jnp.allclose(out, ref_bf, atol=2e-3, rtol=2e-3), "mismatch vs bf16 reference"
        # Semantic check vs full-f32 PyTorch-equivalent math (bounded bf16 quant error).
        ref_f32 = _reference_f32(x, w1, gamma, beta, running_mean, running_var,
                                 w2, b2, temperature, eps)
        assert jnp.allclose(out, ref_f32, atol=2e-2, rtol=2e-2), "mismatch vs f32 reference"

    # Small batch: single grid step, 16-row padded bf16 tile.
    check(jax.random.normal(kx, (8, C0), dtype=jnp.float32), tile_b=1024)
    # Ragged multi-step grid: exercises batch padding + pipelined x/out tiles.
    check(jax.random.normal(kx2, (300, C0), dtype=jnp.float32), tile_b=128)

    print("KERNEL_OK")
</pallas_src>

<mosaic_0001>
module attributes {stable_mosaic.version = 11 : i64} {
  func.func @_mlp_kernel(%arg0: i32, %arg1: memref<16x2048xbf16, #tpu.memory_space<vmem>>, %arg2: memref<2048x256xbf16, #tpu.memory_space<vmem>>, %arg3: memref<1x256xf32, #tpu.memory_space<vmem>>, %arg4: memref<256x128xbf16, #tpu.memory_space<vmem>>, %arg5: memref<1x128xf32, #tpu.memory_space<vmem>>, %arg6: memref<16x128xf32, #tpu.memory_space<vmem>>) attributes {dimension_semantics = [#tpu.dimension_semantics<parallel>], iteration_bounds = array<i64: 1>, scalar_prefetch = 0 : i64, scratch_operands = 0 : i64, tpu.core_type = #tpu.core_type<tc>, window_params = [{transform_indices = @transform_0, window_bounds = array<i64: 16, 2048>}, {pipeline_mode = #tpu.pipeline_mode<synchronous>, transform_indices = @transform_1, window_bounds = array<i64: 2048, 256>}, {pipeline_mode = #tpu.pipeline_mode<synchronous>, transform_indices = @transform_2, window_bounds = array<i64: 1, 256>}, {pipeline_mode = #tpu.pipeline_mode<synchronous>, transform_indices = @transform_3, window_bounds = array<i64: 256, 128>}, {pipeline_mode = #tpu.pipeline_mode<synchronous>, transform_indices = @transform_4, window_bounds = array<i64: 1, 128>}, {transform_indices = @transform_5, window_bounds = array<i64: 16, 128>}]} {
    %c0 = arith.constant 0 : index
    %c0_0 = arith.constant 0 : index
    %0 = vector.load %arg1[%c0, %c0_0] : memref<16x2048xbf16, #tpu.memory_space<vmem>>, vector<16x2048xbf16>
    %c0_1 = arith.constant 0 : index
    %c0_2 = arith.constant 0 : index
    %1 = vector.load %arg2[%c0_1, %c0_2] : memref<2048x256xbf16, #tpu.memory_space<vmem>>, vector<2048x256xbf16>
    %cst = arith.constant dense<0.000000e+00> : vector<16x256xf32>
    %2 = tpu.matmul %0, %1, %cst {dimension_numbers = #tpu.dot_dimension_numbers<[1], [0], [0], [1], [0, 0, 1, 1], [], []>} : vector<16x2048xbf16>, vector<2048x256xbf16>, vector<16x256xf32> -> vector<16x256xf32>
    %c0_3 = arith.constant 0 : index
    %c0_4 = arith.constant 0 : index
    %3 = vector.load %arg3[%c0_3, %c0_4] : memref<1x256xf32, #tpu.memory_space<vmem>>, vector<1x256xf32>
    %4 = vector.broadcast %3 : vector<1x256xf32> to vector<16x256xf32>
    %5 = arith.addf %2, %4 : vector<16x256xf32>
    %cst_5 = arith.constant 0.000000e+00 : f32
    %6 = vector.broadcast %cst_5 : f32 to vector<16x256xf32>
    %7 = arith.maximumf %5, %6 : vector<16x256xf32>
    %8 = arith.truncf %7 : vector<16x256xf32> to vector<16x256xbf16>
    %c0_6 = arith.constant 0 : index
    %c0_7 = arith.constant 0 : index
    %9 = vector.load %arg4[%c0_6, %c0_7] : memref<256x128xbf16, #tpu.memory_space<vmem>>, vector<256x128xbf16>
    %cst_8 = arith.constant dense<0.000000e+00> : vector<16x128xf32>
    %10 = tpu.matmul %8, %9, %cst_8 {dimension_numbers = #tpu.dot_dimension_numbers<[1], [0], [0], [1], [0, 0, 1, 1], [], []>} : vector<16x256xbf16>, vector<256x128xbf16>, vector<16x128xf32> -> vector<16x128xf32>
    %c0_9 = arith.constant 0 : index
    %c0_10 = arith.constant 0 : index
    %11 = vector.load %arg5[%c0_9, %c0_10] : memref<1x128xf32, #tpu.memory_space<vmem>>, vector<1x128xf32>
    %12 = vector.broadcast %11 : vector<1x128xf32> to vector<16x128xf32>
    %13 = arith.addf %10, %12 : vector<16x128xf32>
    %c0_11 = arith.constant 0 : index
    %c0_12 = arith.constant 0 : index
    %14 = vector.load %arg6[%c0_11, %c0_12] : memref<16x128xf32, #tpu.memory_space<vmem>>, vector<16x128xf32>
    tpu.vector_store %arg6[%c0_11, %c0_12], %13 {strides = array<i32>} : memref<16x128xf32, #tpu.memory_space<vmem>>, vector<16x128xf32>,
    return
  }
  func.func @transform_0(%arg0: i32) -> (i32, i32) {
    %c0_i32 = arith.constant 0 : i32
    %c0_i32_0 = arith.constant 0 : i32
    return %arg0, %c0_i32 : i32, i32
  }
  func.func @transform_1(%arg0: i32) -> (i32, i32) {
    %c0_i32 = arith.constant 0 : i32
    %c0_i32_0 = arith.constant 0 : i32
    %c0_i32_1 = arith.constant 0 : i32
    return %c0_i32, %c0_i32_0 : i32, i32
  }
  func.func @transform_2(%arg0: i32) -> (i32, i32) {
    %c0_i32 = arith.constant 0 : i32
    %c0_i32_0 = arith.constant 0 : i32
    %c0_i32_1 = arith.constant 0 : i32
    return %c0_i32, %c0_i32_0 : i32, i32
  }
  func.func @transform_3(%arg0: i32) -> (i32, i32) {
    %c0_i32 = arith.constant 0 : i32
    %c0_i32_0 = arith.constant 0 : i32
    %c0_i32_1 = arith.constant 0 : i32
    return %c0_i32, %c0_i32_0 : i32, i32
  }
  func.func @transform_4(%arg0: i32) -> (i32, i32) {
    %c0_i32 = arith.constant 0 : i32
    %c0_i32_0 = arith.constant 0 : i32
    %c0_i32_1 = arith.constant 0 : i32
    return %c0_i32, %c0_i32_0 : i32, i32
  }
  func.func @transform_5(%arg0: i32) -> (i32, i32) {
    %c0_i32 = arith.constant 0 : i32
    %c0_i32_0 = arith.constant 0 : i32
    return %arg0, %c0_i32 : i32, i32
  }
}

</mosaic_0001>

<bundles_post_ra>
// kernel: mlp_classifier.1
= control target key start
LH: loop header
LB: loop body
LE: loop exit
PB: predicated region body
PF: predicated region fallthrough
CT: control target
= control target key end

     0   :  { %s5548_s1 = inlined_call_operand.vmem [shape: bf16[2048,256], index: 1, kind: input, shape index: {}]   ;;  %s5549_s0 = inlined_call_operand.vmem [shape: bf16[16,2048], index: 0, kind: input, shape index: {}]   ;;  %s5550_s2 = inlined_call_operand.vmem [shape: f32[1,256], index: 2, kind: input, shape index: {}]   ;;  %s5551_s3 = inlined_call_operand.vmem [shape: bf16[256,128], index: 3, kind: input, shape index: {}]   ;;  %s5552_s4 = inlined_call_operand.vmem [shape: f32[1,128], index: 4, kind: input, shape index: {}]   ;;  %s5553_s5 = inlined_call_operand.vmem [shape: f32[16,128], index: 5, kind: output, shape index: {}]  }
   0x1   :  { %v2400_v0 = vld [vmem:[%s5548_s1 + $0x70] sm:$0xf]  ;;  %v3461_v1 = vld [vmem:[%s5548_s1 + $0x74] sm:$0xf0]  ;;  %v2392_v11 = vld [vmem:[%s5548_s1 + $0x60] sm:$0xf] }
   0x2   :  { %v2464_v2 = vld [vmem:[%s5548_s1 + $0xf0] sm:$0xf]  ;;  %v2401_v3 = vor.u32 %v3461_v1, %v2400_v0  ;;  %v3477_v4 = vld [vmem:[%s5548_s1 + $0xf4] sm:$0xf0]  ;;  %v3459_v13 = vld [vmem:[%s5548_s1 + $0x64] sm:$0xf0] }
   0x3   :  { %v2528_v5 = vld [vmem:[%s5548_s1 + $0x170] sm:$0xf]  ;;  %v3493_v6 = vld [vmem:[%s5548_s1 + $0x174] sm:$0xf0]  ;;  %v2465_v7 = vor.u32 %v3477_v4, %v2464_v2  ;;  %v2456_v14 = vld [vmem:[%s5548_s1 + $0xe0] sm:$0xf]  ;;  %v2393_v16 = vor.u32 %v3459_v13, %v2392_v11 }
   0x4   :  { %v2529_v8 = vor.u32 %v3493_v6, %v2528_v5  ;;  %v2592_v9 = vld [vmem:[%s5548_s1 + $0x1f0] sm:$0xf]  ;;  %v3509_v10 = vld [vmem:[%s5548_s1 + $0x1f4] sm:$0xf0]  ;;  %1658 = vmatpush.bf16.msra.mxu0 %v2401_v3  ;;  %v3475_v15 = vld [vmem:[%s5548_s1 + $0xe4] sm:$0xf0] }
   0x5   :  { %v2593_v12 = vor.u32 %v3509_v10, %v2592_v9  ;;  %1672 = vmatpush.bf16.msra.mxu1 %v2465_v7  ;;  %v2457_v17 = vor.u32 %v3475_v15, %v2456_v14  ;;  %v2520_v18 = vld [vmem:[%s5548_s1 + $0x160] sm:$0xf]  ;;  %v3491_v19 = vld [vmem:[%s5548_s1 + $0x164] sm:$0xf0]  ;;  %v2384_v23 = vld [vmem:[%s5548_s1 + $0x50] sm:$0xf] }
   0x6   :  { %1686 = vmatpush.bf16.msra.mxu2 %v2529_v8  ;;  %v2584_v20 = vld [vmem:[%s5548_s1 + $0x1e0] sm:$0xf]  ;;  %v2521_v21 = vor.u32 %v3491_v19, %v2520_v18  ;;  %v3507_v22 = vld [vmem:[%s5548_s1 + $0x1e4] sm:$0xf0]  ;;  %v3457_v24 = vld [vmem:[%s5548_s1 + $0x54] sm:$0xf0] }
   0x7   :  { %1700 = vmatpush.bf16.msra.mxu3 %v2593_v12  ;;  %v2585_v25 = vor.u32 %v3507_v22, %v2584_v20  ;;  %v2448_v26 = vld [vmem:[%s5548_s1 + $0xd0] sm:$0xf]  ;;  %v3473_v27 = vld [vmem:[%s5548_s1 + $0xd4] sm:$0xf0]  ;;  %v2385_v29 = vor.u32 %v3457_v24, %v2384_v23  ;;  %v2376_v35 = vld [vmem:[%s5548_s1 + $0x40] sm:$0xf] }
   0x8   :  { %v2512_v28 = vld [vmem:[%s5548_s1 + $0x150] sm:$0xf]  ;;  %1659 = vmatpush.bf16.msra.mxu0 %v2393_v16  ;;  %v3489_v30 = vld [vmem:[%s5548_s1 + $0x154] sm:$0xf0]  ;;  %v2449_v33 = vor.u32 %v3473_v27, %v2448_v26  ;;  %v3455_v36 = vld [vmem:[%s5548_s1 + $0x44] sm:$0xf0] }
   0x9   :  { %v2576_v31 = vld [vmem:[%s5548_s1 + $0x1d0] sm:$0xf]  ;;  %v3505_v32 = vld [vmem:[%s5548_s1 + $0x1d4] sm:$0xf0]  ;;  %1673 = vmatpush.bf16.msra.mxu1 %v2457_v17  ;;  %v2513_v34 = vor.u32 %v3489_v30, %v2512_v28  ;;  %v2440_v37 = vld [vmem:[%s5548_s1 + $0xc0] sm:$0xf]  ;;  %v2377_v44 = vor.u32 %v3455_v36, %v2376_v35 }
   0xa   :  { %1687 = vmatpush.bf16.msra.mxu2 %v2521_v21  ;;  %v2577_v38 = vor.u32 %v3505_v32, %v2576_v31  ;;  %v3471_v39 = vld [vmem:[%s5548_s1 + $0xc4] sm:$0xf0]  ;;  %v2504_v40 = vld [vmem:[%s5548_s1 + $0x140] sm:$0xf]  ;;  %v2368_v47 = vld [vmem:[%s5548_s1 + $0x30] sm:$0xf] }
   0xb   :  { %1701 = vmatpush.bf16.msra.mxu3 %v2585_v25  ;;  %v3487_v41 = vld [vmem:[%s5548_s1 + $0x144] sm:$0xf0]  ;;  %v2568_v42 = vld [vmem:[%s5548_s1 + $0x1c0] sm:$0xf]  ;;  %v2441_v45 = vor.u32 %v3471_v39, %v2440_v37  ;;  %v3453_v48 = vld [vmem:[%s5548_s1 + $0x34] sm:$0xf0] }
   0xc   :  { %v3503_v43 = vld [vmem:[%s5548_s1 + $0x1c4] sm:$0xf0]  ;;  %1660 = vmatpush.bf16.msra.mxu0 %v2385_v29  ;;  %v2505_v46 = vor.u32 %v3487_v41, %v2504_v40  ;;  %v2432_v49 = vld [vmem:[%s5548_s1 + $0xb0] sm:$0xf]  ;;  %v3469_v51 = vld [vmem:[%s5548_s1 + $0xb4] sm:$0xf0]  ;;  %v2369_v56 = vor.u32 %v3453_v48, %v2368_v47 }
   0xd   :  { %1674 = vmatpush.bf16.msra.mxu1 %v2449_v33  ;;  %v2569_v50 = vor.u32 %v3503_v43, %v2568_v42  ;;  %v2496_v52 = vld [vmem:[%s5548_s1 + $0x130] sm:$0xf]  ;;  %v3485_v53 = vld [vmem:[%s5548_s1 + $0x134] sm:$0xf0]  ;;  %v2433_v57 = vor.u32 %v3469_v51, %v2432_v49  ;;  %v2360_v59 = vld [vmem:[%s5548_s1 + $0x20] sm:$0xf] }
   0xe   :  { %1688 = vmatpush.bf16.msra.mxu2 %v2513_v34  ;;  %v2560_v54 = vld [vmem:[%s5548_s1 + $0x1b0] sm:$0xf]  ;;  %v3501_v55 = vld [vmem:[%s5548_s1 + $0x1b4] sm:$0xf0]  ;;  %v2497_v58 = vor.u32 %v3485_v53, %v2496_v52  ;;  %v3451_v60 = vld [vmem:[%s5548_s1 + $0x24] sm:$0xf0] }
   0xf   :  { %1702 = vmatpush.bf16.msra.mxu3 %v2577_v38  ;;  %v2424_v61 = vld [vmem:[%s5548_s1 + $0xa0] sm:$0xf]  ;;  %v2561_v62 = vor.u32 %v3501_v55, %v2560_v54  ;;  %v3467_v63 = vld [vmem:[%s5548_s1 + $0xa4] sm:$0xf0]  ;;  %v2361_v4 = vor.u32 %v3451_v60, %v2360_v59  ;;  %v2352_v7 = vld [vmem:[%s5548_s1 + $0x10] sm:$0xf] }
  0x10   :  { %1661 = vmatpush.bf16.msra.mxu0 %v2377_v44  ;;  %v2488_v0 = vld [vmem:[%s5548_s1 + $0x120] sm:$0xf]  ;;  %v3483_v1 = vld [vmem:[%s5548_s1 + $0x124] sm:$0xf0]  ;;  %v2425_v5 = vor.u32 %v3467_v63, %v2424_v61  ;;  %v3449_v8 = vld [vmem:[%s5548_s1 + $0x14] sm:$0xf0] }
  0x11   :  { %1675 = vmatpush.bf16.msra.mxu1 %v2441_v45  ;;  %v2552_v2 = vld [vmem:[%s5548_s1 + $0x1a0] sm:$0xf]  ;;  %v3499_v3 = vld [vmem:[%s5548_s1 + $0x1a4] sm:$0xf0]  ;;  %v2489_v6 = vor.u32 %v3483_v1, %v2488_v0  ;;  %v2416_v9 = vld [vmem:[%s5548_s1 + $0x90] sm:$0xf]  ;;  %v2353_v16 = vor.u32 %v3449_v8, %v2352_v7 }
  0x12   :  { %1689 = vmatpush.bf16.msra.mxu2 %v2505_v46  ;;  %v2553_v10 = vor.u32 %v3499_v3, %v2552_v2  ;;  %v3465_v11 = vld [vmem:[%s5548_s1 + $0x94] sm:$0xf0]  ;;  %v2480_v12 = vld [vmem:[%s5548_s1 + $0x110] sm:$0xf]  ;;  %v2344_v17 = vld [vmem:[%s5548_s1] sm:$0xf] }
  0x13   :  { %1703 = vmatpush.bf16.msra.mxu3 %v2569_v50  ;;  %v3481_v13 = vld [vmem:[%s5548_s1 + $0x114] sm:$0xf0]  ;;  %v2544_v14 = vld [vmem:[%s5548_s1 + $0x190] sm:$0xf]  ;;  %v3447_v18 = vld [vmem:[%s5548_s1 + $0x4] sm:$0xf0]  ;;  %v2417_v19 = vor.u32 %v3465_v11, %v2416_v9 }
  0x14   :  { %1662 = vmatpush.bf16.msra.mxu0 %v2369_v56  ;;  %v3497_v15 = vld [vmem:[%s5548_s1 + $0x194] sm:$0xf0]  ;;  %v2481_v20 = vor.u32 %v3481_v13, %v2480_v12  ;;  %v2408_v21 = vld [vmem:[%s5548_s1 + $0x80] sm:$0xf]  ;;  %v3463_v22 = vld [vmem:[%s5548_s1 + $0x84] sm:$0xf0]  ;;  %v2345_v31 = vor.u32 %v3447_v18, %v2344_v17 }
  0x15   :  { %1676 = vmatpush.bf16.msra.mxu1 %v2433_v57  ;;  %v2472_v23 = vld [vmem:[%s5548_s1 + $0x100] sm:$0xf]  ;;  %v2545_v24 = vor.u32 %v3497_v15, %v2544_v14  ;;  %v3479_v25 = vld [vmem:[%s5548_s1 + $0x104] sm:$0xf0]  ;;  %v2656_v28 = vld [vmem:[%s5548_s1 + $0x270] sm:$0xf]  ;;  %v2409_v35 = vor.u32 %v3463_v22, %v2408_v21 }
  0x16   :  { %1690 = vmatpush.bf16.msra.mxu2 %v2497_v58  ;;  %v2536_v26 = vld [vmem:[%s5548_s1 + $0x180] sm:$0xf]  ;;  %v3495_v27 = vld [vmem:[%s5548_s1 + $0x184] sm:$0xf0]  ;;  %v3525_v29 = vld [vmem:[%s5548_s1 + $0x274] sm:$0xf0]  ;;  %v2473_v36 = vor.u32 %v3479_v25, %v2472_v23 }
  0x17   :  { %1704 = vmatpush.bf16.msra.mxu3 %v2561_v62  ;;  %v2720_v30 = vld [vmem:[%s5548_s1 + $0x2f0] sm:$0xf]  ;;  %v3541_v32 = vld [vmem:[%s5548_s1 + $0x2f4] sm:$0xf0]  ;;  %v2537_v39 = vor.u32 %v3495_v27, %v2536_v26  ;;  %v2657_v40 = vor.u32 %v3525_v29, %v2656_v28  ;;  %v2648_v41 = vld [vmem:[%s5548_s1 + $0x260] sm:$0xf] }
  0x18   :  { %1663 = vmatpush.bf16.msra.mxu0 %v2361_v4  ;;  %v2784_v33 = vld [vmem:[%s5548_s1 + $0x370] sm:$0xf]  ;;  %v3557_v34 = vld [vmem:[%s5548_s1 + $0x374] sm:$0xf0]  ;;  %v3523_v42 = vld [vmem:[%s5548_s1 + $0x264] sm:$0xf0]  ;;  %v2721_v43 = vor.u32 %v3541_v32, %v2720_v30 }
  0x19   :  { %1677 = vmatpush.bf16.msra.mxu1 %v2425_v5  ;;  %v2848_v37 = vld [vmem:[%s5548_s1 + $0x3f0] sm:$0xf]  ;;  %v3573_v38 = vld [vmem:[%s5548_s1 + $0x3f4] sm:$0xf0]  ;;  %v2785_v44 = vor.u32 %v3557_v34, %v2784_v33  ;;  %v2712_v45 = vld [vmem:[%s5548_s1 + $0x2e0] sm:$0xf]  ;;  %v2649_v55 = vor.u32 %v3523_v42, %v2648_v41 }
  0x1a   :  { %1691 = vmatpush.bf16.msra.mxu2 %v2489_v6  ;;  %v3539_v46 = vld [vmem:[%s5548_s1 + $0x2e4] sm:$0xf0]  ;;  %v2776_v47 = vld [vmem:[%s5548_s1 + $0x360] sm:$0xf]  ;;  %v2849_v48 = vor.u32 %v3573_v38, %v2848_v37  ;;  %v2640_v56 = vld [vmem:[%s5548_s1 + $0x250] sm:$0xf] }
  0x1b   :  { %1705 = vmatpush.bf16.msra.mxu3 %v2553_v10  ;;  %v3555_v49 = vld [vmem:[%s5548_s1 + $0x364] sm:$0xf0]  ;;  %v2840_v50 = vld [vmem:[%s5548_s1 + $0x3e0] sm:$0xf]  ;;  %v3521_v57 = vld [vmem:[%s5548_s1 + $0x254] sm:$0xf0]  ;;  %v2713_v60 = vor.u32 %v3539_v46, %v2712_v45 }
  0x1c   :  { %1664 = vmatpush.bf16.msra.mxu0 %v2353_v16  ;;  %v3571_v51 = vld [vmem:[%s5548_s1 + $0x3e4] sm:$0xf0]  ;;  %v2280_v52 = vld [vmem:[%s5549_s0] sm:$0xf]  ;;  %v2777_v61 = vor.u32 %v3555_v49, %v2776_v47  ;;  %v2704_v62 = vld [vmem:[%s5548_s1 + $0x2d0] sm:$0xf]  ;;  %v2641_v9 = vor.u32 %v3521_v57, %v2640_v56 }
  0x1d   :  { %1678 = vmatpush.bf16.msra.mxu1 %v2417_v19  ;;  %v3438_v53 = vld [vmem:[%s5549_s0 + $0x3c] sm:$0xf0]  ;;  %v2288_v54 = vld [vmem:[%s5549_s0 + $0x8] sm:$0xf]  ;;  %v3537_v63 = vld [vmem:[%s5548_s1 + $0x2d4] sm:$0xf0]  ;;  %v2841_v2 = vor.u32 %v3571_v51, %v2840_v50 }
  0x1e   :  { %1692 = vmatpush.bf16.msra.mxu2 %v2481_v20  ;;  %v4004_v58 = vor.u32 %v3438_v53, %v2280_v52  ;;  %v3439_v59 = vld [vmem:[%s5549_s0 + $0x44] sm:$0xf0]  ;;  %v2768_v0 = vld [vmem:[%s5548_s1 + $0x350] sm:$0xf]  ;;  %v3553_v3 = vld [vmem:[%s5548_s1 + $0x354] sm:$0xf0]  ;;  %v2705_v12 = vor.u32 %v3537_v63, %v2704_v62 }
  0x1f   :  { %1706 = vmatpush.bf16.msra.mxu3 %v2545_v24  ;;  %v4018_v1 = vor.u32 %v3439_v59, %v2288_v54  ;;  %v2832_v4 = vld [vmem:[%s5548_s1 + $0x3d0] sm:$0xf]  ;;  %v3569_v5 = vld [vmem:[%s5548_s1 + $0x3d4] sm:$0xf0]  ;;  %v3430_v6 = vld [vmem:[%s5549_s0 + $0x4] sm:$0xf]  ;;  %v2769_v13 = vor.u32 %v3553_v3, %v2768_v0 }
  0x20   :  { %1665 = vmatpush.bf16.msra.mxu0 %v2345_v31  ;;  %v2282_v7 = vld [vmem:[%s5549_s0 + $0x40] sm:$0xf0]  ;;  %v3431_v8 = vld [vmem:[%s5549_s0 + $0xc] sm:$0xf]  ;;  %v2632_v14 = vld [vmem:[%s5548_s1 + $0x240] sm:$0xf]  ;;  %v2833_v18 = vor.u32 %v3569_v5, %v2832_v4 }
  0x21   :  { %1679 = vmatpush.bf16.msra.mxu1 %v2409_v35  ;;  %v4040_v10 = vor.u32 %v3430_v6, %v2282_v7  ;;  %v2290_v11 = vld [vmem:[%s5549_s0 + $0x48] sm:$0xf0]  ;;  %v3519_v15 = vld [vmem:[%s5548_s1 + $0x244] sm:$0xf0]  ;;  %v2696_v16 = vld [vmem:[%s5548_s1 + $0x2c0] sm:$0xf] }
  0x22   :  { %1693 = vmatpush.bf16.msra.mxu2 %v2473_v36  ;;  %v4054_v17 = vor.u32 %v3431_v8, %v2290_v11  ;;  %v3535_v19 = vld [vmem:[%s5548_s1 + $0x2c4] sm:$0xf0]  ;;  %v2760_v20 = vld [vmem:[%s5548_s1 + $0x340] sm:$0xf]  ;;  %v2633_v24 = vor.u32 %v3519_v15, %v2632_v14  ;;  %v2624_v27 = vld [vmem:[%s5548_s1 + $0x230] sm:$0xf] }
  0x23   :  { %1707 = vmatpush.bf16.msra.mxu3 %v2537_v39  ;;  %1666 = vmatmul.bf16.vlgmr.msra.gmra.mxu0 %v4004_v58  ;;  %v3551_v21 = vld [vmem:[%s5548_s1 + $0x344] sm:$0xf0]  ;;  %v2824_v22 = vld [vmem:[%s5548_s1 + $0x3c0] sm:$0xf]  ;;  %v2697_v25 = vor.u32 %v3535_v19, %v2696_v16  ;;  %v3517_v28 = vld [vmem:[%s5548_s1 + $0x234] sm:$0xf0] }
  0x24   :  { %1714 = vmatpush.bf16.msrb.mxu0 %v2657_v40  ;;  %1680 = vmatmul.bf16.vlgmr.msra.gmra.mxu1 %v4040_v10  ;;  %v3567_v23 = vld [vmem:[%s5548_s1 + $0x3c4] sm:$0xf0]  ;;  %v2761_v26 = vor.u32 %v3551_v21, %v2760_v20  ;;  %v2688_v29 = vld [vmem:[%s5548_s1 + $0x2b0] sm:$0xf]  ;;  %v3533_v31 = vld [vmem:[%s5548_s1 + $0x2b4] sm:$0xf0]  ;;  %v2625_v36 = vor.u32 %v3517_v28, %v2624_v27 }
  0x25   :  { %1728 = vmatpush.bf16.msrb.mxu1 %v2721_v43  ;;  %1694 = vmatmul.bf16.vlgmr.msra.gmra.mxu2 %v4018_v1  ;;  %v2825_v30 = vor.u32 %v3567_v23, %v2824_v22  ;;  %v2752_v32 = vld [vmem:[%s5548_s1 + $0x330] sm:$0xf]  ;;  %v3549_v33 = vld [vmem:[%s5548_s1 + $0x334] sm:$0xf0]  ;;  %v2689_v37 = vor.u32 %v3533_v31, %v2688_v29  ;;  %v2616_v39 = vld [vmem:[%s5548_s1 + $0x220] sm:$0xf] }
  0x26   :  { %1742 = vmatpush.bf16.msrb.mxu2 %v2785_v44  ;;  %1708 = vmatmul.bf16.vlgmr.msra.gmra.mxu3 %v4054_v17  ;;  %v2816_v34 = vld [vmem:[%s5548_s1 + $0x3b0] sm:$0xf]  ;;  %v3565_v35 = vld [vmem:[%s5548_s1 + $0x3b4] sm:$0xf0]  ;;  %v2753_v38 = vor.u32 %v3549_v33, %v2752_v32  ;;  %v3515_v40 = vld [vmem:[%s5548_s1 + $0x224] sm:$0xf0] }
  0x27   :  { %1756 = vmatpush.bf16.msrb.mxu3 %v2849_v48  ;;  %v2680_v41 = vld [vmem:[%s5548_s1 + $0x2a0] sm:$0xf]  ;;  %v2817_v42 = vor.u32 %v3565_v35, %v2816_v34  ;;  %v3531_v43 = vld [vmem:[%s5548_s1 + $0x2a4] sm:$0xf0]  ;;  %v2617_v48 = vor.u32 %v3515_v40, %v2616_v39  ;;  %v2608_v49 = vld [vmem:[%s5548_s1 + $0x210] sm:$0xf] }
  0x28   :  { %1715 = vmatpush.bf16.msrb.mxu0 %v2649_v55  ;;  %v2744_v44 = vld [vmem:[%s5548_s1 + $0x320] sm:$0xf]  ;;  %v3547_v45 = vld [vmem:[%s5548_s1 + $0x324] sm:$0xf0]  ;;  %v2681_v50 = vor.u32 %v3531_v43, %v2680_v41  ;;  %v3513_v52 = vld [vmem:[%s5548_s1 + $0x214] sm:$0xf0] }
  0x29   :  { %1729 = vmatpush.bf16.msrb.mxu1 %v2713_v60  ;;  %v2808_v46 = vld [vmem:[%s5548_s1 + $0x3a0] sm:$0xf]  ;;  %v3563_v47 = vld [vmem:[%s5548_s1 + $0x3a4] sm:$0xf0]  ;;  %v2745_v51 = vor.u32 %v3547_v45, %v2744_v44  ;;  %v2672_v53 = vld [vmem:[%s5548_s1 + $0x290] sm:$0xf]  ;;  %v2609_v63 = vor.u32 %v3513_v52, %v2608_v49 }
  0x2a   :  { %1743 = vmatpush.bf16.msrb.mxu2 %v2777_v61  ;;  %v3529_v54 = vld [vmem:[%s5548_s1 + $0x294] sm:$0xf0]  ;;  %v2809_v55 = vor.u32 %v3563_v47, %v2808_v46  ;;  %v2736_v56 = vld [vmem:[%s5548_s1 + $0x310] sm:$0xf]  ;;  %v2600_v61 = vld [vmem:[%s5548_s1 + $0x200] sm:$0xf] }
  0x2b   :  { %1757 = vmatpush.bf16.msrb.mxu3 %v2841_v2  ;;  %v3545_v57 = vld [vmem:[%s5548_s1 + $0x314] sm:$0xf0]  ;;  %v2800_v59 = vld [vmem:[%s5548_s1 + $0x390] sm:$0xf]  ;;  %v3511_v62 = vld [vmem:[%s5548_s1 + $0x204] sm:$0xf0]  ;;  %v2673_v5 = vor.u32 %v3529_v54, %v2672_v53 }
  0x2c   :  { %1716 = vmatpush.bf16.msrb.mxu0 %v2641_v9  ;;  %v3561_v60 = vld [vmem:[%s5548_s1 + $0x394] sm:$0xf0]  ;;  %v2664_v0 = vld [vmem:[%s5548_s1 + $0x280] sm:$0xf]  ;;  %v3527_v2 = vld [vmem:[%s5548_s1 + $0x284] sm:$0xf0]  ;;  %v2737_v6 = vor.u32 %v3545_v57, %v2736_v56  ;;  %v2601_v19 = vor.u32 %v3511_v62, %v2600_v61 }
  0x2d   :  { %1730 = vmatpush.bf16.msrb.mxu1 %v2705_v12  ;;  %v2728_v3 = vld [vmem:[%s5548_s1 + $0x300] sm:$0xf]  ;;  %v3543_v4 = vld [vmem:[%s5548_s1 + $0x304] sm:$0xf0]  ;;  %v2912_v9 = vld [vmem:[%s5548_s1 + $0x470] sm:$0xf]  ;;  %v2801_v11 = vor.u32 %v3561_v60, %v2800_v59  ;;  %v2665_v23 = vor.u32 %v3527_v2, %v2664_v0 }
  0x2e   :  { %1744 = vmatpush.bf16.msrb.mxu2 %v2769_v13  ;;  %v2792_v7 = vld [vmem:[%s5548_s1 + $0x380] sm:$0xf]  ;;  %v3559_v8 = vld [vmem:[%s5548_s1 + $0x384] sm:$0xf0]  ;;  %v3589_v12 = vld [vmem:[%s5548_s1 + $0x474] sm:$0xf0] }
  0x2f   :  { %1758 = vmatpush.bf16.msrb.mxu3 %v2833_v18  ;;  %v2976_v13 = vld [vmem:[%s5548_s1 + $0x4f0] sm:$0xf]  ;;  %v3605_v14 = vld [vmem:[%s5548_s1 + $0x4f4] sm:$0xf0]  ;;  %v3432_v27 = vld [vmem:[%s5549_s0 + $0x14] sm:$0xf]  ;;  %v2793_v28 = vor.u32 %v3559_v8, %v2792_v7  ;;  %v2913_v29 = vor.u32 %v3589_v12, %v2912_v9 }
  0x30   :  { %1717 = vmatpush.bf16.msrb.mxu0 %v2633_v24  ;;  %v3040_v15 = vld [vmem:[%s5548_s1 + $0x570] sm:$0xf]  ;;  %v3621_v16 = vld [vmem:[%s5548_s1 + $0x574] sm:$0xf0]  ;;  %v2729_v24 = vor.u32 %v3543_v4, %v2728_v3  ;;  %v3433_v31 = vld [vmem:[%s5549_s0 + $0x1c] sm:$0xf]  ;;  %v2977_v33 = vor.u32 %v3605_v14, %v2976_v13 }
  0x31   :  { %1731 = vmatpush.bf16.msrb.mxu1 %v2697_v25  ;;  %v3104_v18 = vld [vmem:[%s5548_s1 + $0x5f0] sm:$0xf]  ;;  %v3637_v20 = vld [vmem:[%s5548_s1 + $0x5f4] sm:$0xf0]  ;;  %v2306_v32 = vld [vmem:[%s5549_s0 + $0x58] sm:$0xf0]  ;;  %v3041_v34 = vor.u32 %v3621_v16, %v3040_v15 }
  0x32   :  { %1745 = vmatpush.bf16.msrb.mxu2 %v2761_v26  ;;  %v2296_v21 = vld [vmem:[%s5549_s0 + $0x10] sm:$0xf]  ;;  %v2304_v25 = vld [vmem:[%s5549_s0 + $0x18] sm:$0xf]  ;;  %v2904_v35 = vld [vmem:[%s5548_s1 + $0x460] sm:$0xf]  ;;  %v4247_v47 = vor.u32 %v3433_v31, %v2306_v32 }
  0x33   :  { %1759 = vmatpush.bf16.msrb.mxu3 %v2825_v30  ;;  %v3440_v22 = vld [vmem:[%s5549_s0 + $0x4c] sm:$0xf0]  ;;  %v3441_v26 = vld [vmem:[%s5549_s0 + $0x54] sm:$0xf0]  ;;  %v2298_v30 = vld [vmem:[%s5549_s0 + $0x50] sm:$0xf0] }
  0x34   :  { %1718 = vmatpush.bf16.msrb.mxu0 %v2625_v36  ;;  %v3587_v36 = vld [vmem:[%s5548_s1 + $0x464] sm:$0xf0]  ;;  %v4226_v39 = vor.u32 %v3440_v22, %v2296_v21  ;;  %v3032_v41 = vld [vmem:[%s5548_s1 + $0x560] sm:$0xf]  ;;  %v4237_v43 = vor.u32 %v3441_v26, %v2304_v25  ;;  %v4239_v44 = vor.u32 %v3432_v27, %v2298_v30  ;;  %v3585_v52 = vld [vmem:[%s5548_s1 + $0x454] sm:$0xf0] }
  0x35   :  { %1732 = vmatpush.bf16.msrb.mxu1 %v2689_v37  ;;  %v2968_v37 = vld [vmem:[%s5548_s1 + $0x4e0] sm:$0xf]  ;;  %v3603_v40 = vld [vmem:[%s5548_s1 + $0x4e4] sm:$0xf0]  ;;  %v2960_v53 = vld [vmem:[%s5548_s1 + $0x4d0] sm:$0xf] }
  0x36   :  { %1746 = vmatpush.bf16.msrb.mxu2 %v2753_v38  ;;  %v3105_v38 = vor.u32 %v3637_v20, %v3104_v18  ;;  %v3096_v45 = vld [vmem:[%s5548_s1 + $0x5e0] sm:$0xf]  ;;  %v3635_v46 = vld [vmem:[%s5548_s1 + $0x5e4] sm:$0xf0]  ;;  %v2969_v49 = vor.u32 %v3603_v40, %v2968_v37  ;;  %v3024_v56 = vld [vmem:[%s5548_s1 + $0x550] sm:$0xf] }
  0x37   :  { %1760 = vmatpush.bf16.msrb.mxu3 %v2817_v42  ;;  %v3619_v42 = vld [vmem:[%s5548_s1 + $0x564] sm:$0xf0]  ;;  %v3097_v54 = vor.u32 %v3635_v46, %v3096_v45  ;;  %v3617_v57 = vld [vmem:[%s5548_s1 + $0x554] sm:$0xf0]  ;;  %v3088_v59 = vld [vmem:[%s5548_s1 + $0x5d0] sm:$0xf] }
  0x38   :  { %1719 = vmatpush.bf16.msrb.mxu0 %v2617_v48  ;;  %v2905_v48 = vor.u32 %v3587_v36, %v2904_v35  ;;  %v3633_v60 = vld [vmem:[%s5548_s1 + $0x5d4] sm:$0xf0]  ;;  %v2888_v0 = vld [vmem:[%s5548_s1 + $0x440] sm:$0xf]  ;;  %v3583_v2 = vld [vmem:[%s5548_s1 + $0x444] sm:$0xf0] }
  0x39   :  { %1733 = vmatpush.bf16.msrb.mxu1 %v2681_v50  ;;  %v3033_v50 = vor.u32 %v3619_v42, %v3032_v41  ;;  %v2952_v3 = vld [vmem:[%s5548_s1 + $0x4c0] sm:$0xf]  ;;  %v3089_v4 = vor.u32 %v3633_v60, %v3088_v59  ;;  %v3615_v7 = vld [vmem:[%s5548_s1 + $0x544] sm:$0xf0]  ;;  %v2880_v14 = vld [vmem:[%s5548_s1 + $0x430] sm:$0xf] }
  0x3a   :  { %1747 = vmatpush.bf16.msrb.mxu2 %v2745_v51  ;;  %v2896_v51 = vld [vmem:[%s5548_s1 + $0x450] sm:$0xf]  ;;  %v3080_v8 = vld [vmem:[%s5548_s1 + $0x5c0] sm:$0xf]  ;;  %v3631_v9 = vld [vmem:[%s5548_s1 + $0x5c4] sm:$0xf0] }
  0x3b   :  { %1761 = vmatpush.bf16.msrb.mxu3 %v2809_v55  ;;  %v3601_v55 = vld [vmem:[%s5548_s1 + $0x4d4] sm:$0xf0]  ;;  %v2897_v61 = vor.u32 %v3585_v52, %v2896_v51  ;;  %v2944_v16 = vld [vmem:[%s5548_s1 + $0x4b0] sm:$0xf]  ;;  %v3081_v18 = vor.u32 %v3631_v9, %v3080_v8  ;;  %v2872_v27 = vld [vmem:[%s5548_s1 + $0x420] sm:$0xf] }
  0x3c   :  { %1720 = vmatpush.bf16.msrb.mxu0 %v2609_v63  ;;  %v2961_v62 = vor.u32 %v3601_v55, %v2960_v53  ;;  %v3025_v63 = vor.u32 %v3617_v57, %v3024_v56  ;;  %v3581_v15 = vld [vmem:[%s5548_s1 + $0x434] sm:$0xf0]  ;;  %v3008_v20 = vld [vmem:[%s5548_s1 + $0x530] sm:$0xf]  ;;  %v3595_v31 = vld [vmem:[%s5548_s1 + $0x4a4] sm:$0xf0] }
  0x3d   :  { %1734 = vmatpush.bf16.msrb.mxu1 %v2673_v5  ;;  %v3599_v5 = vld [vmem:[%s5548_s1 + $0x4c4] sm:$0xf0]  ;;  %v3613_v21 = vld [vmem:[%s5548_s1 + $0x534] sm:$0xf0]  ;;  %v3072_v22 = vld [vmem:[%s5548_s1 + $0x5b0] sm:$0xf] }
  0x3e   :  { %1748 = vmatpush.bf16.msrb.mxu2 %v2737_v6  ;;  %v3016_v6 = vld [vmem:[%s5548_s1 + $0x540] sm:$0xf]  ;;  %v2953_v12 = vor.u32 %v3599_v5, %v2952_v3  ;;  %v3009_v26 = vor.u32 %v3613_v21, %v3008_v20  ;;  %v3627_v35 = vld [vmem:[%s5548_s1 + $0x5a4] sm:$0xf0]  ;;  %v2864_v37 = vld [vmem:[%s5548_s1 + $0x410] sm:$0xf] }
  0x3f   :  { %1762 = vmatpush.bf16.msrb.mxu3 %v2801_v11  ;;  %v2889_v11 = vor.u32 %v3583_v2, %v2888_v0  ;;  %v3017_v13 = vor.u32 %v3615_v7, %v3016_v6  ;;  %v3000_v32 = vld [vmem:[%s5548_s1 + $0x520] sm:$0xf]  ;;  %v3577_v41 = vld [vmem:[%s5548_s1 + $0x414] sm:$0xf0]  ;;  %v2928_v42 = vld [vmem:[%s5548_s1 + $0x490] sm:$0xf] }
  0x40   :  { %1721 = vmatpush.bf16.msrb.mxu0 %v2601_v19  ;;  %v3597_v19 = vld [vmem:[%s5548_s1 + $0x4b4] sm:$0xf0]  ;;  %v2856_v52 = vld [vmem:[%s5548_s1 + $0x400] sm:$0xf]  ;;  %v3575_v53 = vld [vmem:[%s5548_s1 + $0x404] sm:$0xf0] }
  0x41   :  { %1735 = vmatpush.bf16.msrb.mxu1 %v2665_v23  ;;  %v3629_v23 = vld [vmem:[%s5548_s1 + $0x5b4] sm:$0xf0]  ;;  %v2945_v25 = vor.u32 %v3597_v19, %v2944_v16  ;;  %v2920_v55 = vld [vmem:[%s5548_s1 + $0x480] sm:$0xf]  ;;  %v3591_v56 = vld [vmem:[%s5548_s1 + $0x484] sm:$0xf0]  ;;  %v2857_v9 = vor.u32 %v3575_v53, %v2856_v52 }
  0x42   :  { %1749 = vmatpush.bf16.msrb.mxu2 %v2729_v24  ;;  %v2881_v24 = vor.u32 %v3581_v15, %v2880_v14  ;;  %v3073_v30 = vor.u32 %v3629_v23, %v3072_v22  ;;  %v3593_v45 = vld [vmem:[%s5548_s1 + $0x494] sm:$0xf0]  ;;  %v2984_v57 = vld [vmem:[%s5548_s1 + $0x500] sm:$0xf]  ;;  %v3607_v59 = vld [vmem:[%s5548_s1 + $0x504] sm:$0xf0]  ;;  %v2921_v14 = vor.u32 %v3591_v56, %v2920_v55 }
  0x43   :  { %1763 = vmatpush.bf16.msrb.mxu3 %v2793_v28  ;;  %1722 = vmatmul.bf16.vlgmr.msrb.gmra.mxu0 %v4226_v39  ;;  %v3579_v28 = vld [vmem:[%s5548_s1 + $0x424] sm:$0xf0]  ;;  %v3625_v51 = vld [vmem:[%s5548_s1 + $0x594] sm:$0xf0]  ;;  %v2929_v60 = vor.u32 %v3593_v45, %v2928_v42  ;;  %v3168_v0 = vld [vmem:[%s5548_s1 + $0x670] sm:$0xf]  ;;  %v2985_v15 = vor.u32 %v3607_v59, %v2984_v57 }
  0x44   :  { %1770 = vmatpush.bf16.msra.mxu0 %v2913_v29  ;;  %1736 = vmatmul.bf16.vlgmr.msrb.gmra.mxu1 %v4239_v44  ;;  %v2936_v29 = vld [vmem:[%s5548_s1 + $0x4a0] sm:$0xf]  ;;  %v2873_v36 = vor.u32 %v3579_v28, %v2872_v27  ;;  %v3653_v3 = vld [vmem:[%s5548_s1 + $0x674] sm:$0xf0]  ;;  %v3296_v6 = vld [vmem:[%s5548_s1 + $0x770] sm:$0xf] }
  0x45   :  { %1784 = vmatpush.bf16.msra.mxu1 %v2977_v33  ;;  %1750 = vmatmul.bf16.vlgmr.msrb.gmra.mxu2 %v4237_v43  ;;  %v3611_v33 = vld [vmem:[%s5548_s1 + $0x524] sm:$0xf0]  ;;  %v3669_v5 = vld [vmem:[%s5548_s1 + $0x6f4] sm:$0xf0]  ;;  %v3360_v8 = vld [vmem:[%s5548_s1 + $0x7f0] sm:$0xf]  ;;  %v3169_v21 = vor.u32 %v3653_v3, %v3168_v0 }
  0x46   :  { %1798 = vmatpush.bf16.msra.mxu2 %v3041_v34  ;;  %1764 = vmatmul.bf16.vlgmr.msrb.gmra.mxu3 %v4247_v47  ;;  %v3064_v34 = vld [vmem:[%s5548_s1 + $0x5a0] sm:$0xf]  ;;  %v3001_v40 = vor.u32 %v3611_v33, %v3000_v32  ;;  %v3685_v7 = vld [vmem:[%s5548_s1 + $0x774] sm:$0xf0]  ;;  %v2320_v16 = vld [vmem:[%s5549_s0 + $0x28] sm:$0xf] }
  0x47   :  { %1812 = vmatpush.bf16.msra.mxu3 %v3105_v38  ;;  %v2937_v38 = vor.u32 %v3595_v31, %v2936_v29  ;;  %v3065_v46 = vor.u32 %v3627_v35, %v3064_v34  ;;  %v3434_v19 = vld [vmem:[%s5549_s0 + $0x24] sm:$0xf]  ;;  %v3435_v23 = vld [vmem:[%s5549_s0 + $0x2c] sm:$0xf]  ;;  %v3160_v27 = vld [vmem:[%s5548_s1 + $0x660] sm:$0xf] }
  0x48   :  { %1771 = vmatpush.bf16.msra.mxu0 %v2905_v48  ;;  %v2992_v48 = vld [vmem:[%s5548_s1 + $0x510] sm:$0xf]  ;;  %v2314_v22 = vld [vmem:[%s5549_s0 + $0x60] sm:$0xf0]  ;;  %v3651_v28 = vld [vmem:[%s5548_s1 + $0x664] sm:$0xf0] }
  0x49   :  { %1785 = vmatpush.bf16.msra.mxu1 %v2969_v49  ;;  %v3609_v49 = vld [vmem:[%s5548_s1 + $0x514] sm:$0xf0]  ;;  %v3224_v29 = vld [vmem:[%s5548_s1 + $0x6e0] sm:$0xf]  ;;  %v3667_v32 = vld [vmem:[%s5548_s1 + $0x6e4] sm:$0xf0] }
  0x4a   :  { %1799 = vmatpush.bf16.msra.mxu2 %v3033_v50  ;;  %v3056_v50 = vld [vmem:[%s5548_s1 + $0x590] sm:$0xf]  ;;  %v3288_v33 = vld [vmem:[%s5548_s1 + $0x760] sm:$0xf]  ;;  %v3683_v34 = vld [vmem:[%s5548_s1 + $0x764] sm:$0xf0]  ;;  %v3225_v42 = vor.u32 %v3667_v32, %v3224_v29 }
  0x4b   :  { %1813 = vmatpush.bf16.msra.mxu3 %v3097_v54  ;;  %v2865_v54 = vor.u32 %v3577_v41, %v2864_v37  ;;  %v3057_v2 = vor.u32 %v3625_v51, %v3056_v50  ;;  %v3352_v37 = vld [vmem:[%s5548_s1 + $0x7e0] sm:$0xf]  ;;  %v3161_v41 = vor.u32 %v3651_v28, %v3160_v27  ;;  %v3289_v45 = vor.u32 %v3683_v34, %v3288_v33  ;;  %v3665_v51 = vld [vmem:[%s5548_s1 + $0x6d4] sm:$0xf0]  ;;  %v3280_v52 = vld [vmem:[%s5548_s1 + $0x750] sm:$0xf] }
  0x4c   :  { %1772 = vmatpush.bf16.msra.mxu0 %v2897_v61  ;;  %v2993_v61 = vor.u32 %v3609_v49, %v2992_v48  ;;  %v3649_v48 = vld [vmem:[%s5548_s1 + $0x654] sm:$0xf0]  ;;  %v3216_v49 = vld [vmem:[%s5548_s1 + $0x6d0] sm:$0xf]  ;;  %v3663_v0 = vld [vmem:[%s5548_s1 + $0x6c4] sm:$0xf0] }
  0x4d   :  { %1786 = vmatpush.bf16.msra.mxu1 %v2961_v62  ;;  %v3048_v62 = vld [vmem:[%s5548_s1 + $0x580] sm:$0xf]  ;;  %v3681_v53 = vld [vmem:[%s5548_s1 + $0x754] sm:$0xf0]  ;;  %v3217_v57 = vor.u32 %v3665_v51, %v3216_v49  ;;  %v3679_v3 = vld [vmem:[%s5548_s1 + $0x744] sm:$0xf0] }
  0x4e   :  { %1800 = vmatpush.bf16.msra.mxu2 %v3025_v63  ;;  %v3623_v63 = vld [vmem:[%s5548_s1 + $0x584] sm:$0xf0]  ;;  %v3697_v55 = vld [vmem:[%s5548_s1 + $0x7d4] sm:$0xf0]  ;;  %v3281_v59 = vor.u32 %v3681_v53, %v3280_v52  ;;  %v3256_v28 = vld [vmem:[%s5548_s1 + $0x720] sm:$0xf] }
  0x4f   :  { %1814 = vmatpush.bf16.msra.mxu3 %v3089_v4  ;;  %v3232_v4 = vld [vmem:[%s5548_s1 + $0x6f0] sm:$0xf]  ;;  %v3049_v20 = vor.u32 %v3623_v63, %v3048_v62  ;;  %v3208_v62 = vld [vmem:[%s5548_s1 + $0x6c0] sm:$0xf]  ;;  %v3659_v27 = vld [vmem:[%s5548_s1 + $0x6a4] sm:$0xf0] }
  0x50   :  { %1773 = vmatpush.bf16.msra.mxu0 %v2889_v11  ;;  %v3701_v11 = vld [vmem:[%s5548_s1 + $0x7f4] sm:$0xf0]  ;;  %v3675_v29 = vld [vmem:[%s5548_s1 + $0x724] sm:$0xf0]  ;;  %v3120_v34 = vld [vmem:[%s5548_s1 + $0x610] sm:$0xf] }
  0x51   :  { %1787 = vmatpush.bf16.msra.mxu1 %v2953_v12  ;;  %v2312_v12 = vld [vmem:[%s5549_s0 + $0x20] sm:$0xf]  ;;  %v3691_v32 = vld [vmem:[%s5548_s1 + $0x7a4] sm:$0xf0]  ;;  %v3673_v49 = vld [vmem:[%s5548_s1 + $0x714] sm:$0xf0] }
  0x52   :  { %1801 = vmatpush.bf16.msra.mxu2 %v3017_v13  ;;  %v3442_v13 = vld [vmem:[%s5549_s0 + $0x5c] sm:$0xf0]  ;;  %v3689_v51 = vld [vmem:[%s5548_s1 + $0x794] sm:$0xf0]  ;;  %v3639_v53 = vld [vmem:[%s5548_s1 + $0x604] sm:$0xf0] }
  0x53   :  { %1815 = vmatpush.bf16.msra.mxu3 %v3081_v18  ;;  %v3443_v18 = vld [vmem:[%s5549_s0 + $0x64] sm:$0xf0]  ;;  %v4454_v31 = vor.u32 %v3442_v13, %v2312_v12  ;;  %v3200_v12 = vld [vmem:[%s5548_s1 + $0x6b0] sm:$0xf]  ;;  %v3112_v52 = vld [vmem:[%s5548_s1 + $0x600] sm:$0xf] }
  0x54   :  { %1774 = vmatpush.bf16.msra.mxu0 %v2881_v24  ;;  %v2322_v24 = vld [vmem:[%s5549_s0 + $0x68] sm:$0xf0]  ;;  %v4465_v35 = vor.u32 %v3443_v18, %v2320_v16  ;;  %v3677_v16 = vld [vmem:[%s5548_s1 + $0x734] sm:$0xf0]  ;;  %v3328_v18 = vld [vmem:[%s5548_s1 + $0x7b0] sm:$0xf] }
  0x55   :  { %1788 = vmatpush.bf16.msra.mxu1 %v2945_v25  ;;  %v3233_v25 = vor.u32 %v3669_v5, %v3232_v4  ;;  %v3336_v4 = vld [vmem:[%s5548_s1 + $0x7c0] sm:$0xf]  ;;  %v3695_v5 = vld [vmem:[%s5548_s1 + $0x7c4] sm:$0xf0] }
  0x56   :  { %1802 = vmatpush.bf16.msra.mxu2 %v3009_v26  ;;  %v3297_v26 = vor.u32 %v3685_v7, %v3296_v6  ;;  %v3209_v7 = vor.u32 %v3663_v0, %v3208_v62  ;;  %v3337_v13 = vor.u32 %v3695_v5, %v3336_v4  ;;  %v3304_v62 = vld [vmem:[%s5548_s1 + $0x780] sm:$0xf]  ;;  %v3460_v0 = vld [vmem:[%s5548_s1 + $0x74] sm:$0xf]  ;;  %v2466_v5 = vld [vmem:[%s5548_s1 + $0xf8] sm:$0xf0] }
  0x57   :  { %1816 = vmatpush.bf16.msra.mxu3 %v3073_v30  ;;  %v3361_v30 = vor.u32 %v3701_v11, %v3360_v8  ;;  %v3645_v11 = vld [vmem:[%s5548_s1 + $0x634] sm:$0xf0]  ;;  %v3476_v4 = vld [vmem:[%s5548_s1 + $0xf4] sm:$0xf] }
  0x58   :  { %1775 = vmatpush.bf16.msra.mxu0 %v2873_v36  ;;  %v4467_v36 = vor.u32 %v3434_v19, %v2314_v22  ;;  %v3693_v19 = vld [vmem:[%s5548_s1 + $0x7b4] sm:$0xf0] }
  0x59   :  { %1789 = vmatpush.bf16.msra.mxu1 %v2937_v38  ;;  %v3699_v38 = vld [vmem:[%s5548_s1 + $0x7e4] sm:$0xf0] }
  0x5a   :  { %1803 = vmatpush.bf16.msra.mxu2 %v3001_v40  ;;  %v4475_v40 = vor.u32 %v3435_v23, %v2322_v24  ;;  %v3353_v50 = vor.u32 %v3699_v38, %v3352_v37  ;;  %v3128_v23 = vld [vmem:[%s5548_s1 + $0x620] sm:$0xf]  ;;  %v3643_v24 = vld [vmem:[%s5548_s1 + $0x624] sm:$0xf0]  ;;  %v3257_v38 = vor.u32 %v3675_v29, %v3256_v28  ;;  %v2394_v28 = vld [vmem:[%s5548_s1 + $0x68] sm:$0xf0] }
  0x5b   :  { %1817 = vmatpush.bf16.msra.mxu3 %v3065_v46  ;;  %v3152_v46 = vld [vmem:[%s5548_s1 + $0x650] sm:$0xf]  ;;  %v3129_v33 = vor.u32 %v3643_v24, %v3128_v23  ;;  %v3437_v23 = vld [vmem:[%s5549_s0 + $0x3c] sm:$0xf]  ;;  %v3474_v29 = vld [vmem:[%s5548_s1 + $0xe4] sm:$0xf] }
  0x5c   :  { %1776 = vmatpush.bf16.msra.mxu0 %v2865_v54  ;;  %v3344_v54 = vld [vmem:[%s5548_s1 + $0x7d0] sm:$0xf]  ;;  %v3153_v56 = vor.u32 %v3649_v48, %v3152_v46  ;;  %v2338_v24 = vld [vmem:[%s5549_s0 + $0x78] sm:$0xf0] }
  0x5d   :  { %1790 = vmatpush.bf16.msra.mxu1 %v2929_v60  ;;  %v3144_v60 = vld [vmem:[%s5548_s1 + $0x640] sm:$0xf]  ;;  %v3345_v63 = vor.u32 %v3697_v55, %v3344_v54  ;;  %v3248_v48 = vld [vmem:[%s5548_s1 + $0x710] sm:$0xf] }
  0x5e   :  { %1804 = vmatpush.bf16.msra.mxu2 %v2993_v61  ;;  %v3647_v61 = vld [vmem:[%s5548_s1 + $0x644] sm:$0xf0]  ;;  %v3176_v55 = vld [vmem:[%s5548_s1 + $0x680] sm:$0xf] }
  0x5f   :  { %1818 = vmatpush.bf16.msra.mxu3 %v3057_v2  ;;  %v3272_v2 = vld [vmem:[%s5548_s1 + $0x740] sm:$0xf]  ;;  %v3145_v6 = vor.u32 %v3647_v61, %v3144_v60  ;;  %v3249_v61 = vor.u32 %v3673_v49, %v3248_v48 }
  0x60   :  { %1777 = vmatpush.bf16.msra.mxu0 %v2857_v9  ;;  %v3273_v8 = vor.u32 %v3679_v3, %v3272_v2  ;;  %v3136_v9 = vld [vmem:[%s5548_s1 + $0x630] sm:$0xf]  ;;  %v2402_v3 = vld [vmem:[%s5548_s1 + $0x78] sm:$0xf0] }
  0x61   :  { %1791 = vmatpush.bf16.msra.mxu1 %v2921_v14  ;;  %v3661_v14 = vld [vmem:[%s5548_s1 + $0x6b4] sm:$0xf0] }
  0x62   :  { %1805 = vmatpush.bf16.msra.mxu2 %v2985_v15  ;;  %v3264_v15 = vld [vmem:[%s5548_s1 + $0x730] sm:$0xf] }
  0x63   :  { %1819 = vmatpush.bf16.msra.mxu3 %v3049_v20  ;;  %1778 = vmatmul.bf16.vlgmr.msra.gmra.mxu0 %v4454_v31  ;;  %v3137_v20 = vor.u32 %v3645_v11, %v3136_v9  ;;  %v3265_v22 = vor.u32 %v3677_v16, %v3264_v15  ;;  %v3113_v9 = vor.u32 %v3639_v53, %v3112_v52  ;;  %v2594_v11 = vld [vmem:[%s5548_s1 + $0x1f8] sm:$0xf0]  ;;  %v2336_v16 = vld [vmem:[%s5549_s0 + $0x38] sm:$0xf]  ;;  %v3472_v53 = vld [vmem:[%s5548_s1 + $0xd4] sm:$0xf] }
  0x64   :  { %1826 = vmatpush.bf16.msrb.mxu0 %v3169_v21  ;;  %1792 = vmatmul.bf16.vlgmr.msra.gmra.mxu1 %v4467_v36  ;;  %v3201_v21 = vor.u32 %v3661_v14, %v3200_v12  ;;  %v2328_v12 = vld [vmem:[%s5549_s0 + $0x30] sm:$0xf]  ;;  %v2386_v52 = vld [vmem:[%s5548_s1 + $0x58] sm:$0xf0] }
  0x65   :  { %1840 = vmatpush.bf16.msrb.mxu1 %v3233_v25  ;;  %1806 = vmatmul.bf16.vlgmr.msra.gmra.mxu2 %v4465_v35  ;;  %v3192_v25 = vld [vmem:[%s5548_s1 + $0x6a0] sm:$0xf] }
  0x66   :  { %1854 = vmatpush.bf16.msrb.mxu2 %v3297_v26  ;;  %1820 = vmatmul.bf16.vlgmr.msra.gmra.mxu3 %v4475_v40  ;;  %v3329_v26 = vor.u32 %v3693_v19, %v3328_v18  ;;  %v3193_v37 = vor.u32 %v3659_v27, %v3192_v25  ;;  %v3445_v18 = vld [vmem:[%s5549_s0 + $0x74] sm:$0xf0]  ;;  %v3436_v19 = vld [vmem:[%s5549_s0 + $0x34] sm:$0xf]  ;;  %v2469_v25 = vor.u32 %v3476_v4, %v2466_v5  ;;  %v3458_v27 = vld [vmem:[%s5548_s1 + $0x64] sm:$0xf] }
  0x67   :  { %1868 = vmatpush.bf16.msrb.mxu3 %v3361_v30  ;;  %v3320_v30 = vld [vmem:[%s5548_s1 + $0x7a0] sm:$0xf]  ;;  %v2397_v48 = vor.u32 %v3458_v27, %v2394_v28  ;;  %v2442_v5 = vld [vmem:[%s5548_s1 + $0xc8] sm:$0xf0]  ;;  %v3450_v27 = vld [vmem:[%s5548_s1 + $0x24] sm:$0xf] }
  0x68   :  { %1827 = vmatpush.bf16.msrb.mxu0 %v3161_v41  ;;  %v3641_v41 = vld [vmem:[%s5548_s1 + $0x614] sm:$0xf0]  ;;  %v3321_v46 = vor.u32 %v3691_v32, %v3320_v30  ;;  %v2362_v28 = vld [vmem:[%s5548_s1 + $0x28] sm:$0xf0] }
  0x69   :  { %1841 = vmatpush.bf16.msrb.mxu1 %v3225_v42  ;;  %v3184_v42 = vld [vmem:[%s5548_s1 + $0x690] sm:$0xf]  ;;  %v3121_v54 = vor.u32 %v3641_v41, %v3120_v34  ;;  %v3490_v34 = vld [vmem:[%s5548_s1 + $0x164] sm:$0xf] }
  0x6a   :  { %1855 = vmatpush.bf16.msrb.mxu2 %v3289_v45  ;;  %v3657_v45 = vld [vmem:[%s5548_s1 + $0x694] sm:$0xf0] }
  0x6b   :  { %1869 = vmatpush.bf16.msrb.mxu3 %v3353_v50  ;;  %v3312_v50 = vld [vmem:[%s5548_s1 + $0x790] sm:$0xf]  ;;  %v3185_v60 = vor.u32 %v3657_v45, %v3184_v42  ;;  %v3506_v42 = vld [vmem:[%s5548_s1 + $0x1e4] sm:$0xf]  ;;  %v2586_v45 = vld [vmem:[%s5548_s1 + $0x1e8] sm:$0xf0] }
  0x6c   :  { %1828 = vmatpush.bf16.msrb.mxu0 %v3153_v56  ;;  %v3655_v56 = vld [vmem:[%s5548_s1 + $0x684] sm:$0xf0]  ;;  %v3313_v2 = vor.u32 %v3689_v51, %v3312_v50  ;;  %v3456_v51 = vld [vmem:[%s5548_s1 + $0x54] sm:$0xf] }
  0x6d   :  { %1842 = vmatpush.bf16.msrb.mxu1 %v3217_v57  ;;  %v3240_v57 = vld [vmem:[%s5548_s1 + $0x700] sm:$0xf]  ;;  %v3177_v14 = vor.u32 %v3655_v56, %v3176_v55  ;;  %v2450_v55 = vld [vmem:[%s5548_s1 + $0xd8] sm:$0xf0]  ;;  %v3488_v56 = vld [vmem:[%s5548_s1 + $0x154] sm:$0xf] }
  0x6e   :  { %1856 = vmatpush.bf16.msrb.mxu2 %v3281_v59  ;;  %v3671_v59 = vld [vmem:[%s5548_s1 + $0x704] sm:$0xf0] }
  0x6f   :  { %1870 = vmatpush.bf16.msrb.mxu3 %v3345_v63  ;;  %v3687_v63 = vld [vmem:[%s5548_s1 + $0x784] sm:$0xf0]  ;;  %v3241_v15 = vor.u32 %v3671_v59, %v3240_v57  ;;  %v2514_v57 = vld [vmem:[%s5548_s1 + $0x158] sm:$0xf0]  ;;  %v3504_v59 = vld [vmem:[%s5548_s1 + $0x1d4] sm:$0xf] }
  0x70   :  { %1829 = vmatpush.bf16.msrb.mxu0 %v3145_v6  ;;  %v3492_v6 = vld [vmem:[%s5548_s1 + $0x174] sm:$0xf] }
  0x71   :  { %1843 = vmatpush.bf16.msrb.mxu1 %v3209_v7  ;;  %v2530_v7 = vld [vmem:[%s5548_s1 + $0x178] sm:$0xf0] }
  0x72   :  { %1857 = vmatpush.bf16.msrb.mxu2 %v3273_v8  ;;  %v3508_v8 = vld [vmem:[%s5548_s1 + $0x1f4] sm:$0xf] }
  0x73   :  { %1871 = vmatpush.bf16.msrb.mxu3 %v3337_v13  ;;  %v3444_v13 = vld [vmem:[%s5549_s0 + $0x6c] sm:$0xf0]  ;;  %v2597_v30 = vor.u32 %v3508_v8, %v2594_v11  ;;  %v3502_v8 = vld [vmem:[%s5548_s1 + $0x1c4] sm:$0xf] }
  0x74   :  { %1830 = vmatpush.bf16.msrb.mxu0 %v3137_v20  ;;  %v3305_v20 = vor.u32 %v3687_v63, %v3304_v62  ;;  %v4682_v32 = vor.u32 %v3444_v13, %v2328_v12  ;;  %v2453_v62 = vor.u32 %v3472_v53, %v2450_v55  ;;  %v2517_v63 = vor.u32 %v3488_v56, %v2514_v57  ;;  %v3464_v53 = vld [vmem:[%s5548_s1 + $0x94] sm:$0xf]  ;;  %v2418_v55 = vld [vmem:[%s5548_s1 + $0x98] sm:$0xf0] }
  0x75   :  { %1844 = vmatpush.bf16.msrb.mxu1 %v3201_v21  ;;  %v2405_v21 = vor.u32 %v3460_v0, %v2402_v3  ;;  %v3454_v0 = vld [vmem:[%s5548_s1 + $0x44] sm:$0xf]  ;;  %v3480_v56 = vld [vmem:[%s5548_s1 + $0x114] sm:$0xf]  ;;  %v2482_v57 = vld [vmem:[%s5548_s1 + $0x118] sm:$0xf0] }
  0x76   :  { %1858 = vmatpush.bf16.msrb.mxu2 %v3265_v22  ;;  %v2330_v22 = vld [vmem:[%s5549_s0 + $0x70] sm:$0xf0]  ;;  %v3470_v3 = vld [vmem:[%s5548_s1 + $0xc4] sm:$0xf] }
  0x77   :  { %1872 = vmatpush.bf16.msrb.mxu3 %v3329_v26  ;;  %v2533_v26 = vor.u32 %v3492_v6, %v2530_v7  ;;  %v4695_v41 = vor.u32 %v3436_v19, %v2330_v22  ;;  %v3486_v6 = vld [vmem:[%s5548_s1 + $0x144] sm:$0xf]  ;;  %v2506_v7 = vld [vmem:[%s5548_s1 + $0x148] sm:$0xf0]  ;;  %v2445_v12 = vor.u32 %v3470_v3, %v2442_v5  ;;  %v2434_v19 = vld [vmem:[%s5548_s1 + $0xb8] sm:$0xf0] }
  0x78   :  { %1831 = vmatpush.bf16.msrb.mxu0 %v3129_v33  ;;  %v2458_v33 = vld [vmem:[%s5548_s1 + $0xe8] sm:$0xf0]  ;;  %v2509_v13 = vor.u32 %v3486_v6, %v2506_v7  ;;  %v3500_v22 = vld [vmem:[%s5548_s1 + $0x1b4] sm:$0xf]  ;;  %v3462_v3 = vld [vmem:[%s5548_s1 + $0x84] sm:$0xf] }
  0x79   :  { %1845 = vmatpush.bf16.msrb.mxu1 %v3193_v37  ;;  %v2522_v37 = vld [vmem:[%s5548_s1 + $0x168] sm:$0xf0]  ;;  %v2461_v49 = vor.u32 %v3474_v29, %v2458_v33  ;;  %v3466_v29 = vld [vmem:[%s5548_s1 + $0xa4] sm:$0xf] }
  0x7a   :  { %1859 = vmatpush.bf16.msrb.mxu2 %v3257_v38  ;;  %v4693_v38 = vor.u32 %v3445_v18, %v2336_v16  ;;  %v2525_v50 = vor.u32 %v3490_v34, %v2522_v37  ;;  %v3468_v16 = vld [vmem:[%s5548_s1 + $0xb4] sm:$0xf]  ;;  %v2426_v33 = vld [vmem:[%s5548_s1 + $0xa8] sm:$0xf0]  ;;  %v3482_v34 = vld [vmem:[%s5548_s1 + $0x124] sm:$0xf] }
  0x7b   :  { %1873 = vmatpush.bf16.msrb.mxu3 %v3321_v46  ;;  %v4703_v46 = vor.u32 %v3437_v23, %v2338_v24  ;;  %v2562_v23 = vld [vmem:[%s5548_s1 + $0x1b8] sm:$0xf0]  ;;  %v2490_v37 = vld [vmem:[%s5548_s1 + $0x128] sm:$0xf0]  ;;  %v3478_v5 = vld [vmem:[%s5548_s1 + $0x104] sm:$0xf] }
  0x7c   :  { %1832 = vmatpush.bf16.msrb.mxu0 %v3121_v54  ;;  %v2589_v54 = vor.u32 %v3506_v42, %v2586_v45  ;;  %v3498_v42 = vld [vmem:[%s5548_s1 + $0x1a4] sm:$0xf]  ;;  %v2554_v45 = vld [vmem:[%s5548_s1 + $0x1a8] sm:$0xf0] }
  0x7d   :  { %1846 = vmatpush.bf16.msrb.mxu1 %v3185_v60  ;;  %v2578_v60 = vld [vmem:[%s5548_s1 + $0x1d8] sm:$0xf0]  ;;  %v2474_v7 = vld [vmem:[%s5548_s1 + $0x108] sm:$0xf0] }
  0x7e   :  { %1860 = vmatpush.bf16.msrb.mxu2 %v3249_v61  ;;  %v2389_v61 = vor.u32 %v3456_v51, %v2386_v52  ;;  %v2581_v4 = vor.u32 %v3504_v59, %v2578_v60  ;;  %v3448_v51 = vld [vmem:[%s5548_s1 + $0x14] sm:$0xf]  ;;  %v2354_v52 = vld [vmem:[%s5548_s1 + $0x18] sm:$0xf0] }
  0x7f   :  { %1874 = vmatpush.bf16.msrb.mxu3 %v3313_v2  ;;  %v2378_v2 = vld [vmem:[%s5548_s1 + $0x48] sm:$0xf0]  ;;  %v3496_v59 = vld [vmem:[%s5548_s1 + $0x194] sm:$0xf]  ;;  %v2546_v60 = vld [vmem:[%s5548_s1 + $0x198] sm:$0xf0] }
  0x80   :  { %1833 = vmatpush.bf16.msrb.mxu0 %v3113_v9  ;;  %v2570_v9 = vld [vmem:[%s5548_s1 + $0x1c8] sm:$0xf0]  ;;  %v2381_v11 = vor.u32 %v3454_v0, %v2378_v2  ;;  %v2421_v0 = vor.u32 %v3464_v53, %v2418_v55  ;;  %v2485_v2 = vor.u32 %v3480_v56, %v2482_v57  ;;  %v2549_v6 = vor.u32 %v3496_v59, %v2546_v60  ;;  %v3536_v53 = vld [vmem:[%s5548_s1 + $0x2d4] sm:$0xf]  ;;  %v2706_v55 = vld [vmem:[%s5548_s1 + $0x2d8] sm:$0xf0] }
  0x81   :  { %1847 = vmatpush.bf16.msrb.mxu1 %v3177_v14  ;;  %v3452_v14 = vld [vmem:[%s5548_s1 + $0x34] sm:$0xf]  ;;  %v2573_v18 = vor.u32 %v3502_v8, %v2570_v9  ;;  %v3494_v8 = vld [vmem:[%s5548_s1 + $0x184] sm:$0xf]  ;;  %v2538_v9 = vld [vmem:[%s5548_s1 + $0x188] sm:$0xf0] }
  0x82   :  { %1861 = vmatpush.bf16.msrb.mxu2 %v3241_v15  ;;  %v2370_v15 = vld [vmem:[%s5548_s1 + $0x38] sm:$0xf0]  ;;  %v3552_v56 = vld [vmem:[%s5548_s1 + $0x354] sm:$0xf] }
  0x83   :  { %1875 = vmatpush.bf16.msrb.mxu3 %v3305_v20  ;;  %1834 = vmatmul.bf16.vlgmr.msrb.gmra.mxu0 %v4682_v32  ;;  %v3484_v20 = vld [vmem:[%s5548_s1 + $0x134] sm:$0xf]  ;;  %v2373_v24 = vor.u32 %v3452_v14, %v2370_v15  ;;  %v2722_v15 = vld [vmem:[%s5548_s1 + $0x2f8] sm:$0xf0] }
  0x84   :  { %1882 = vmatpush.bf16.msra.mxu0 %v2405_v21  ;;  %1848 = vmatmul.bf16.vlgmr.msrb.gmra.mxu1 %v4695_v41  ;;  %v2498_v21 = vld [vmem:[%s5548_s1 + $0x138] sm:$0xf0]  ;;  %v3568_v59 = vld [vmem:[%s5548_s1 + $0x3d4] sm:$0xf] }
  0x85   :  { %1896 = vmatpush.bf16.msra.mxu1 %v2469_v25  ;;  %1862 = vmatmul.bf16.vlgmr.msrb.gmra.mxu2 %v4693_v38  ;;  %v2437_v25 = vor.u32 %v3468_v16, %v2434_v19  ;;  %v3556_v16 = vld [vmem:[%s5548_s1 + $0x374] sm:$0xf]  ;;  %v2770_v57 = vld [vmem:[%s5548_s1 + $0x358] sm:$0xf0] }
  0x86   :  { %1910 = vmatpush.bf16.msra.mxu2 %v2533_v26  ;;  %1876 = vmatmul.bf16.vlgmr.msrb.gmra.mxu3 %v4703_v46  ;;  %v2501_v26 = vor.u32 %v3484_v20, %v2498_v21  ;;  %v2477_v20 = vor.u32 %v3478_v5, %v2474_v7  ;;  %v3572_v21 = vld [vmem:[%s5548_s1 + $0x3f4] sm:$0xf]  ;;  %v2834_v60 = vld [vmem:[%s5548_s1 + $0x3d8] sm:$0xf0]  ;;  %v2826_v5 = vld [vmem:[%s5548_s1 + $0x3c8] sm:$0xf0] }
  0x87   :  { %1924 = vmatpush.bf16.msra.mxu3 %v2597_v30  ;;  %v2565_v30 = vor.u32 %v3500_v22, %v2562_v23  ;;  %v2850_v22 = vld [vmem:[%s5548_s1 + $0x3f8] sm:$0xf0]  ;;  %v2541_v23 = vor.u32 %v3494_v8, %v2538_v9  ;;  %v3516_v9 = vld [vmem:[%s5548_s1 + $0x234] sm:$0xf] }
  0x88   :  { %1883 = vmatpush.bf16.msra.mxu0 %v2397_v48  ;;  %v2365_v48 = vor.u32 %v3450_v27, %v2362_v28  ;;  %v3522_v27 = vld [vmem:[%s5548_s1 + $0x264] sm:$0xf]  ;;  %v2650_v28 = vld [vmem:[%s5548_s1 + $0x268] sm:$0xf0] }
  0x89   :  { %1897 = vmatpush.bf16.msra.mxu1 %v2461_v49  ;;  %v2429_v49 = vor.u32 %v3466_v29, %v2426_v33  ;;  %v3538_v29 = vld [vmem:[%s5548_s1 + $0x2e4] sm:$0xf]  ;;  %v2714_v33 = vld [vmem:[%s5548_s1 + $0x2e8] sm:$0xf0] }
  0x8a   :  { %1911 = vmatpush.bf16.msra.mxu2 %v2525_v50  ;;  %v2493_v50 = vor.u32 %v3482_v34, %v2490_v37  ;;  %v3554_v34 = vld [vmem:[%s5548_s1 + $0x364] sm:$0xf]  ;;  %v2778_v37 = vld [vmem:[%s5548_s1 + $0x368] sm:$0xf0] }
  0x8b   :  { %1925 = vmatpush.bf16.msra.mxu3 %v2589_v54  ;;  %v2557_v54 = vor.u32 %v3498_v42, %v2554_v45  ;;  %v3570_v42 = vld [vmem:[%s5548_s1 + $0x3e4] sm:$0xf]  ;;  %v2842_v45 = vld [vmem:[%s5548_s1 + $0x3e8] sm:$0xf0] }
  0x8c   :  { %1884 = vmatpush.bf16.msra.mxu0 %v2389_v61  ;;  %v2357_v61 = vor.u32 %v3448_v51, %v2354_v52  ;;  %v3520_v51 = vld [vmem:[%s5548_s1 + $0x254] sm:$0xf]  ;;  %v2642_v52 = vld [vmem:[%s5548_s1 + $0x258] sm:$0xf0] }
  0x8d   :  { %1898 = vmatpush.bf16.msra.mxu1 %v2453_v62  ;;  %v3446_v62 = vld [vmem:[%s5548_s1 + $0x4] sm:$0xf] }
  0x8e   :  { %1912 = vmatpush.bf16.msra.mxu2 %v2517_v63  ;;  %v2346_v63 = vld [vmem:[%s5548_s1 + $0x8] sm:$0xf0] }
  0x8f   :  { %1926 = vmatpush.bf16.msra.mxu3 %v2581_v4  ;;  %v2410_v4 = vld [vmem:[%s5548_s1 + $0x88] sm:$0xf0]  ;;  %v2349_v14 = vor.u32 %v3446_v62, %v2346_v63  ;;  %v2709_v62 = vor.u32 %v3536_v53, %v2706_v55  ;;  %v3518_v63 = vld [vmem:[%s5548_s1 + $0x244] sm:$0xf]  ;;  %v2738_v53 = vld [vmem:[%s5548_s1 + $0x318] sm:$0xf0] }
  0x90   :  { %1885 = vmatpush.bf16.msra.mxu0 %v2381_v11  ;;  %v3524_v11 = vld [vmem:[%s5548_s1 + $0x274] sm:$0xf]  ;;  %v2413_v19 = vor.u32 %v3462_v3, %v2410_v4  ;;  %v2762_v3 = vld [vmem:[%s5548_s1 + $0x348] sm:$0xf0]  ;;  %v3566_v4 = vld [vmem:[%s5548_s1 + $0x3c4] sm:$0xf] }
  0x91   :  { %1899 = vmatpush.bf16.msra.mxu1 %v2445_v12  ;;  %v2658_v12 = vld [vmem:[%s5548_s1 + $0x278] sm:$0xf0] }
  0x92   :  { %1913 = vmatpush.bf16.msra.mxu2 %v2509_v13  ;;  %v3540_v13 = vld [vmem:[%s5548_s1 + $0x2f4] sm:$0xf]  ;;  %v2802_v55 = vld [vmem:[%s5548_s1 + $0x398] sm:$0xf0] }
  0x93   :  { %1927 = vmatpush.bf16.msra.mxu3 %v2573_v18  ;;  %v2786_v18 = vld [vmem:[%s5548_s1 + $0x378] sm:$0xf0] }
  0x94   :  { %1886 = vmatpush.bf16.msra.mxu0 %v2373_v24  ;;  %v2661_v24 = vor.u32 %v3524_v11, %v2658_v12  ;;  %v2626_v11 = vld [vmem:[%s5548_s1 + $0x238] sm:$0xf0]  ;;  %v3532_v12 = vld [vmem:[%s5548_s1 + $0x2b4] sm:$0xf] }
  0x95   :  { %1900 = vmatpush.bf16.msra.mxu1 %v2437_v25  ;;  %v2725_v25 = vor.u32 %v3540_v13, %v2722_v15  ;;  %v2829_v13 = vor.u32 %v3566_v4, %v2826_v5  ;;  %v3548_v15 = vld [vmem:[%s5548_s1 + $0x334] sm:$0xf] }
  0x96   :  { %1914 = vmatpush.bf16.msra.mxu2 %v2501_v26  ;;  %v2789_v26 = vor.u32 %v3556_v16, %v2786_v18  ;;  %v2754_v16 = vld [vmem:[%s5548_s1 + $0x338] sm:$0xf0]  ;;  %v3564_v18 = vld [vmem:[%s5548_s1 + $0x3b4] sm:$0xf] }
  0x97   :  { %1928 = vmatpush.bf16.msra.mxu3 %v2565_v30  ;;  %v2853_v30 = vor.u32 %v3572_v21, %v2850_v22  ;;  %v2757_v22 = vor.u32 %v3548_v15, %v2754_v16  ;;  %v3604_v4 = vld [vmem:[%s5548_s1 + $0x4f4] sm:$0xf] }
  0x98   :  { %1887 = vmatpush.bf16.msra.mxu0 %v2365_v48  ;;  %v2653_v48 = vor.u32 %v3522_v27, %v2650_v28  ;;  %v2682_v27 = vld [vmem:[%s5548_s1 + $0x2a8] sm:$0xf0]  ;;  %v3546_v28 = vld [vmem:[%s5548_s1 + $0x324] sm:$0xf] }
  0x99   :  { %1901 = vmatpush.bf16.msra.mxu1 %v2429_v49  ;;  %v2717_v49 = vor.u32 %v3538_v29, %v2714_v33  ;;  %v2746_v29 = vld [vmem:[%s5548_s1 + $0x328] sm:$0xf0] }
  0x9a   :  { %1915 = vmatpush.bf16.msra.mxu2 %v2493_v50  ;;  %v2781_v50 = vor.u32 %v3554_v34, %v2778_v37  ;;  %v2810_v33 = vld [vmem:[%s5548_s1 + $0x3a8] sm:$0xf0] }
  0x9b   :  { %1929 = vmatpush.bf16.msra.mxu3 %v2557_v54  ;;  %v2845_v54 = vor.u32 %v3570_v42, %v2842_v45  ;;  %v2749_v42 = vor.u32 %v3546_v28, %v2746_v29  ;;  %v3512_v45 = vld [vmem:[%s5548_s1 + $0x214] sm:$0xf] }
  0x9c   :  { %1888 = vmatpush.bf16.msra.mxu0 %v2357_v61  ;;  %v2645_v61 = vor.u32 %v3520_v51, %v2642_v52  ;;  %v2674_v51 = vld [vmem:[%s5548_s1 + $0x298] sm:$0xf0]  ;;  %v3544_v52 = vld [vmem:[%s5548_s1 + $0x314] sm:$0xf] }
  0x9d   :  { %1902 = vmatpush.bf16.msra.mxu1 %v2421_v0  ;;  %v2634_v0 = vld [vmem:[%s5548_s1 + $0x248] sm:$0xf0] }
  0x9e   :  { %1916 = vmatpush.bf16.msra.mxu2 %v2485_v2  ;;  %v3550_v2 = vld [vmem:[%s5548_s1 + $0x344] sm:$0xf] }
  0x9f   :  { %1930 = vmatpush.bf16.msra.mxu3 %v2549_v6  ;;  %v2637_v6 = vor.u32 %v3518_v63, %v2634_v0  ;;  %v2765_v8 = vor.u32 %v3550_v2, %v2762_v3  ;;  %v3542_v63 = vld [vmem:[%s5548_s1 + $0x304] sm:$0xf]  ;;  %v3588_v2 = vld [vmem:[%s5548_s1 + $0x474] sm:$0xf]  ;;  %v2914_v3 = vld [vmem:[%s5548_s1 + $0x478] sm:$0xf0] }
  0xa0   :  { %1889 = vmatpush.bf16.msra.mxu0 %v2349_v14  ;;  %v2690_v14 = vld [vmem:[%s5548_s1 + $0x2b8] sm:$0xf0]  ;;  %v2917_v15 = vor.u32 %v3588_v2, %v2914_v3  ;;  %v3612_v2 = vld [vmem:[%s5548_s1 + $0x534] sm:$0xf] }
  0xa1   :  { %1903 = vmatpush.bf16.msra.mxu1 %v2413_v19  ;;  %v2818_v19 = vld [vmem:[%s5548_s1 + $0x3b8] sm:$0xf0]  ;;  %v2693_v21 = vor.u32 %v3532_v12, %v2690_v14  ;;  %v3636_v12 = vld [vmem:[%s5548_s1 + $0x5f4] sm:$0xf] }
  0xa2   :  { %1917 = vmatpush.bf16.msra.mxu2 %v2477_v20  ;;  %v2629_v20 = vor.u32 %v3516_v9, %v2626_v11  ;;  %v3010_v3 = vld [vmem:[%s5548_s1 + $0x538] sm:$0xf0] }
  0xa3   :  { %1931 = vmatpush.bf16.msra.mxu3 %v2541_v23  ;;  %1890 = vmatmul.bf16.vlgmr.msra.gmra.mxu0 %v4004_v58  ;;  %v2773_v58 = vor.u32 %v3552_v56, %v2770_v57  ;;  %v3514_v23 = vld [vmem:[%s5548_s1 + $0x224] sm:$0xf] }
  0xa4   :  { %1938 = vmatpush.bf16.msrb.mxu0 %v2661_v24  ;;  %1904 = vmatmul.bf16.vlgmr.msra.gmra.mxu1 %v4040_v10  ;;  %v2837_v10 = vor.u32 %v3568_v59, %v2834_v60  ;;  %v2618_v24 = vld [vmem:[%s5548_s1 + $0x228] sm:$0xf0]  ;;  %v3510_v57 = vld [vmem:[%s5548_s1 + $0x204] sm:$0xf] }
  0xa5   :  { %1952 = vmatpush.bf16.msrb.mxu1 %v2725_v25  ;;  %1918 = vmatmul.bf16.vlgmr.msra.gmra.mxu2 %v4018_v1  ;;  %v3534_v1 = vld [vmem:[%s5548_s1 + $0x2c4] sm:$0xf]  ;;  %v2621_v34 = vor.u32 %v3514_v23, %v2618_v24  ;;  %v2602_v59 = vld [vmem:[%s5548_s1 + $0x208] sm:$0xf0] }
  0xa6   :  { %1966 = vmatpush.bf16.msrb.mxu2 %v2789_v26  ;;  %1932 = vmatmul.bf16.vlgmr.msra.gmra.mxu3 %v4054_v17  ;;  %v2698_v17 = vld [vmem:[%s5548_s1 + $0x2c8] sm:$0xf0]  ;;  %v3530_v25 = vld [vmem:[%s5548_s1 + $0x2a4] sm:$0xf]  ;;  %v2821_v26 = vor.u32 %v3564_v18, %v2818_v19  ;;  %v2605_v5 = vor.u32 %v3510_v57, %v2602_v59 }
  0xa7   :  { %1980 = vmatpush.bf16.msrb.mxu3 %v2853_v30  ;;  %v2701_v7 = vor.u32 %v3534_v1, %v2698_v17  ;;  %v3562_v30 = vld [vmem:[%s5548_s1 + $0x3a4] sm:$0xf]  ;;  %v2685_v37 = vor.u32 %v3530_v25, %v2682_v27  ;;  %v2730_v1 = vld [vmem:[%s5548_s1 + $0x308] sm:$0xf0] }
  0xa8   :  { %1939 = vmatpush.bf16.msrb.mxu0 %v2653_v48  ;;  %v2610_v48 = vld [vmem:[%s5548_s1 + $0x218] sm:$0xf0]  ;;  %v2794_v17 = vld [vmem:[%s5548_s1 + $0x388] sm:$0xf0]  ;;  %v2733_v11 = vor.u32 %v3542_v63, %v2730_v1  ;;  %v3586_v19 = vld [vmem:[%s5548_s1 + $0x464] sm:$0xf] }
  0xa9   :  { %1953 = vmatpush.bf16.msrb.mxu1 %v2717_v49  ;;  %v3528_v49 = vld [vmem:[%s5548_s1 + $0x294] sm:$0xf]  ;;  %v2613_v56 = vor.u32 %v3512_v45, %v2610_v48  ;;  %v2970_v23 = vld [vmem:[%s5548_s1 + $0x4e8] sm:$0xf0]  ;;  %v3618_v24 = vld [vmem:[%s5548_s1 + $0x564] sm:$0xf] }
  0xaa   :  { %1967 = vmatpush.bf16.msrb.mxu2 %v2781_v50  ;;  %v2813_v50 = vor.u32 %v3562_v30, %v2810_v33  ;;  %v2677_v60 = vor.u32 %v3528_v49, %v2674_v51  ;;  %v3034_v25 = vld [vmem:[%s5548_s1 + $0x568] sm:$0xf0]  ;;  %v3584_v33 = vld [vmem:[%s5548_s1 + $0x454] sm:$0xf]  ;;  %v2962_v45 = vld [vmem:[%s5548_s1 + $0x4d8] sm:$0xf0] }
  0xab   :  { %1981 = vmatpush.bf16.msrb.mxu3 %v2845_v54  ;;  %v3560_v54 = vld [vmem:[%s5548_s1 + $0x394] sm:$0xf]  ;;  %v3098_v27 = vld [vmem:[%s5548_s1 + $0x5e8] sm:$0xf0]  ;;  %v3037_v30 = vor.u32 %v3618_v24, %v3034_v25  ;;  %v3026_v49 = vld [vmem:[%s5548_s1 + $0x558] sm:$0xf0] }
  0xac   :  { %1940 = vmatpush.bf16.msrb.mxu0 %v2645_v61  ;;  %v2741_v61 = vor.u32 %v3544_v52, %v2738_v53  ;;  %v2805_v0 = vor.u32 %v3560_v54, %v2802_v55  ;;  %v3616_v48 = vld [vmem:[%s5548_s1 + $0x554] sm:$0xf]  ;;  %v3598_v54 = vld [vmem:[%s5548_s1 + $0x4c4] sm:$0xf]  ;;  %v2954_v55 = vld [vmem:[%s5548_s1 + $0x4c8] sm:$0xf0] }
  0xad   :  { %1954 = vmatpush.bf16.msrb.mxu1 %v2709_v62  ;;  %v3526_v62 = vld [vmem:[%s5548_s1 + $0x284] sm:$0xf]  ;;  %v3029_v53 = vor.u32 %v3616_v48, %v3026_v49  ;;  %v3018_v57 = vld [vmem:[%s5548_s1 + $0x548] sm:$0xf0]  ;;  %v3580_v63 = vld [vmem:[%s5548_s1 + $0x434] sm:$0xf] }
  0xae   :  { %1968 = vmatpush.bf16.msrb.mxu2 %v2773_v58  ;;  %v2666_v58 = vld [vmem:[%s5548_s1 + $0x288] sm:$0xf0]  ;;  %v3630_v59 = vld [vmem:[%s5548_s1 + $0x5c4] sm:$0xf]  ;;  %v3596_v1 = vld [vmem:[%s5548_s1 + $0x4b4] sm:$0xf] }
  0xaf   :  { %1982 = vmatpush.bf16.msrb.mxu3 %v2837_v10  ;;  %v3558_v10 = vld [vmem:[%s5548_s1 + $0x384] sm:$0xf]  ;;  %v2669_v9 = vor.u32 %v3526_v62, %v2666_v58  ;;  %v2957_v62 = vor.u32 %v3598_v54, %v2954_v55  ;;  %v3576_v25 = vld [vmem:[%s5548_s1 + $0x414] sm:$0xf] }
  0xb0   :  { %1941 = vmatpush.bf16.msrb.mxu0 %v2637_v6  ;;  %v2978_v6 = vld [vmem:[%s5548_s1 + $0x4f8] sm:$0xf0]  ;;  %v2797_v14 = vor.u32 %v3558_v10, %v2794_v17  ;;  %v3574_v49 = vld [vmem:[%s5548_s1 + $0x404] sm:$0xf] }
  0xb1   :  { %1955 = vmatpush.bf16.msrb.mxu1 %v2701_v7  ;;  %v3620_v7 = vld [vmem:[%s5548_s1 + $0x574] sm:$0xf]  ;;  %v2981_v16 = vor.u32 %v3604_v4, %v2978_v6  ;;  %v2946_v17 = vld [vmem:[%s5548_s1 + $0x4b8] sm:$0xf0]  ;;  %v5167_v4 = vpop.f32.mrf.mxu0  ;;  %v3606_v54 = vld [vmem:[%s5548_s1 + $0x504] sm:$0xf] }
  0xb2   :  { %1969 = vmatpush.bf16.msrb.mxu2 %v2765_v8  ;;  %v3042_v8 = vld [vmem:[%s5548_s1 + $0x578] sm:$0xf0] }
  0xb3   :  { %1983 = vmatpush.bf16.msrb.mxu3 %v2829_v13  ;;  %v3106_v13 = vld [vmem:[%s5548_s1 + $0x5f8] sm:$0xf0]  ;;  %v3045_v18 = vor.u32 %v3620_v7, %v3042_v8  ;;  %v5175_v7 = vpop.f32.mrf.mxu1 }
  0xb4   :  { %1942 = vmatpush.bf16.msrb.mxu0 %v2629_v20  ;;  %v2906_v20 = vld [vmem:[%s5548_s1 + $0x468] sm:$0xf0]  ;;  %v3074_v6 = vld [vmem:[%s5548_s1 + $0x5b8] sm:$0xf0] }
  0xb5   :  { %1956 = vmatpush.bf16.msrb.mxu1 %v2693_v21  ;;  %v3602_v21 = vld [vmem:[%s5548_s1 + $0x4e4] sm:$0xf]  ;;  %v2909_v28 = vor.u32 %v3586_v19, %v2906_v20  ;;  %v3002_v19 = vld [vmem:[%s5548_s1 + $0x528] sm:$0xf0] }
  0xb6   :  { %1970 = vmatpush.bf16.msrb.mxu2 %v2757_v22  ;;  %v3109_v22 = vor.u32 %v3636_v12, %v3106_v13  ;;  %v2973_v29 = vor.u32 %v3602_v21, %v2970_v23  ;;  %v3578_v12 = vld [vmem:[%s5548_s1 + $0x424] sm:$0xf]  ;;  %v2874_v13 = vld [vmem:[%s5548_s1 + $0x428] sm:$0xf0] }
  0xb7   :  { %1984 = vmatpush.bf16.msrb.mxu3 %v2821_v26  ;;  %v3634_v26 = vld [vmem:[%s5548_s1 + $0x5e4] sm:$0xf]  ;;  %v3066_v21 = vld [vmem:[%s5548_s1 + $0x5a8] sm:$0xf0] }
  0xb8   :  { %1943 = vmatpush.bf16.msrb.mxu0 %v2621_v34  ;;  %v2898_v34 = vld [vmem:[%s5548_s1 + $0x458] sm:$0xf0]  ;;  %v3626_v20 = vld [vmem:[%s5548_s1 + $0x5a4] sm:$0xf] }
  0xb9   :  { %1957 = vmatpush.bf16.msrb.mxu1 %v2685_v37  ;;  %v3600_v37 = vld [vmem:[%s5548_s1 + $0x4d4] sm:$0xf]  ;;  %v2901_v51 = vor.u32 %v3584_v33, %v2898_v34  ;;  %v2994_v34 = vld [vmem:[%s5548_s1 + $0x518] sm:$0xf0] }
  0xba   :  { %1971 = vmatpush.bf16.msrb.mxu2 %v2749_v42  ;;  %v3101_v42 = vor.u32 %v3634_v26, %v3098_v27  ;;  %v2965_v52 = vor.u32 %v3600_v37, %v2962_v45  ;;  %v2866_v26 = vld [vmem:[%s5548_s1 + $0x418] sm:$0xf0]  ;;  %v3592_v27 = vld [vmem:[%s5548_s1 + $0x494] sm:$0xf]  ;;  %v5221_v37 = vpop.f32.mrf.mxu3 }
  0xbb   :  { %1985 = vmatpush.bf16.msrb.mxu3 %v2813_v50  ;;  %v3090_v50 = vld [vmem:[%s5548_s1 + $0x5d8] sm:$0xf0]  ;;  %v3608_v33 = vld [vmem:[%s5548_s1 + $0x514] sm:$0xf]  ;;  %v2869_v48 = vor.u32 %v3576_v25, %v2866_v26 }
  0xbc   :  { %1944 = vmatpush.bf16.msrb.mxu0 %v2613_v56  ;;  %v3614_v56 = vld [vmem:[%s5548_s1 + $0x544] sm:$0xf]  ;;  %v3058_v45 = vld [vmem:[%s5548_s1 + $0x598] sm:$0xf0] }
  0xbd   :  { %1958 = vmatpush.bf16.msrb.mxu1 %v2677_v60  ;;  %v3082_v60 = vld [vmem:[%s5548_s1 + $0x5c8] sm:$0xf0]  ;;  %v3021_v58 = vor.u32 %v3614_v56, %v3018_v57  ;;  %v3622_v57 = vld [vmem:[%s5548_s1 + $0x584] sm:$0xf] }
  0xbe   :  { %1972 = vmatpush.bf16.msrb.mxu2 %v2741_v61  ;;  %v3085_v10 = vor.u32 %v3630_v59, %v3082_v60  ;;  %v2986_v56 = vld [vmem:[%s5548_s1 + $0x508] sm:$0xf0]  ;;  %v3652_v60 = vld [vmem:[%s5548_s1 + $0x674] sm:$0xf] }
  0xbf   :  { %1986 = vmatpush.bf16.msrb.mxu3 %v2805_v0  ;;  %v2882_v0 = vld [vmem:[%s5548_s1 + $0x438] sm:$0xf0]  ;;  %v3050_v59 = vld [vmem:[%s5548_s1 + $0x588] sm:$0xf0] }
  0xc0   :  { %1945 = vmatpush.bf16.msrb.mxu0 %v2605_v5  ;;  %v3628_v5 = vld [vmem:[%s5548_s1 + $0x5b4] sm:$0xf]  ;;  %v2885_v8 = vor.u32 %v3580_v63, %v2882_v0  ;;  %v3234_v63 = vld [vmem:[%s5548_s1 + $0x6f8] sm:$0xf0] }
  0xc1   :  { %1959 = vmatpush.bf16.msrb.mxu1 %v2669_v9  ;;  %v2949_v9 = vor.u32 %v3596_v1, %v2946_v17  ;;  %v3684_v0 = vld [vmem:[%s5548_s1 + $0x774] sm:$0xf]  ;;  %v3298_v1 = vld [vmem:[%s5548_s1 + $0x778] sm:$0xf0]  ;;  %v2989_v17 = vor.u32 %v3606_v54, %v2986_v56  ;;  %v3274_v56 = vld [vmem:[%s5548_s1 + $0x748] sm:$0xf0] }
  0xc2   :  { %1973 = vmatpush.bf16.msrb.mxu2 %v2733_v11  ;;  %v3013_v11 = vor.u32 %v3612_v2, %v3010_v3  ;;  %v3700_v2 = vld [vmem:[%s5548_s1 + $0x7f4] sm:$0xf]  ;;  %v3362_v3 = vld [vmem:[%s5548_s1 + $0x7f8] sm:$0xf0] }
  0xc3   :  { %1987 = vmatpush.bf16.msrb.mxu3 %v2797_v14  ;;  %1946 = vmatmul.bf16.vlgmr.msrb.gmra.mxu0 %v4226_v39  ;;  %v3632_v39 = vld [vmem:[%s5548_s1 + $0x5d4] sm:$0xf]  ;;  %v3594_v14 = vld [vmem:[%s5548_s1 + $0x4a4] sm:$0xf] }
  0xc4   :  { %1994 = vmatpush.bf16.msra.mxu0 %v2917_v15  ;;  %1960 = vmatmul.bf16.vlgmr.msrb.gmra.mxu1 %v4239_v44  ;;  %v2890_v44 = vld [vmem:[%s5548_s1 + $0x448] sm:$0xf0]  ;;  %v3077_v15 = vor.u32 %v3628_v5, %v3074_v6  ;;  %v3053_v6 = vor.u32 %v3622_v57, %v3050_v59  ;;  %v3694_v59 = vld [vmem:[%s5548_s1 + $0x7c4] sm:$0xf] }
  0xc5   :  { %2008 = vmatpush.bf16.msra.mxu1 %v2981_v16  ;;  %1974 = vmatmul.bf16.vlgmr.msrb.gmra.mxu2 %v4237_v43  ;;  %v3582_v43 = vld [vmem:[%s5548_s1 + $0x444] sm:$0xf]  ;;  %v2938_v16 = vld [vmem:[%s5548_s1 + $0x4a8] sm:$0xf0] }
  0xc6   :  { %2022 = vmatpush.bf16.msra.mxu2 %v3045_v18  ;;  %1988 = vmatmul.bf16.vlgmr.msrb.gmra.mxu3 %v4247_v47  ;;  %v3093_v47 = vor.u32 %v3632_v39, %v3090_v50  ;;  %v2893_v61 = vor.u32 %v3582_v43, %v2890_v44  ;;  %v3610_v18 = vld [vmem:[%s5548_s1 + $0x524] sm:$0xf]  ;;  %v2941_v23 = vor.u32 %v3594_v14, %v2938_v16  ;;  %v2858_v39 = vld [vmem:[%s5548_s1 + $0x408] sm:$0xf0]  ;;  %v5238_v50 = vld [vmem:[%s5550_s2] sm:$0x3] }
  0xc7   :  { %2036 = vmatpush.bf16.msra.mxu3 %v3109_v22  ;;  %v2877_v22 = vor.u32 %v3578_v12, %v2874_v13  ;;  %v3005_v24 = vor.u32 %v3610_v18, %v3002_v19  ;;  %v3590_v43 = vld [vmem:[%s5548_s1 + $0x484] sm:$0xf]  ;;  %v2922_v44 = vld [vmem:[%s5548_s1 + $0x488] sm:$0xf0]  ;;  %v294_v5 = vperm.slane %v5238_v50, 0  ;;  %v3365_v16 = vor.u32 %v3700_v2, %v3362_v3 }
  0xc8   :  { %1995 = vmatpush.bf16.msra.mxu0 %v2909_v28  ;;  %v5210_v28 = vpop.f32.mrf.mxu2  ;;  %v3650_v12 = vld [vmem:[%s5548_s1 + $0x664] sm:$0xf]  ;;  %v3162_v13 = vld [vmem:[%s5548_s1 + $0x668] sm:$0xf0]  ;;  %v3202_v2 = vld [vmem:[%s5548_s1 + $0x6b8] sm:$0xf0] }
  0xc9   :  { %2009 = vmatpush.bf16.msra.mxu1 %v2973_v29  ;;  %v3069_v29 = vor.u32 %v3626_v20, %v3066_v21  ;;  %v3666_v14 = vld [vmem:[%s5548_s1 + $0x6e4] sm:$0xf]  ;;  %v3226_v18 = vld [vmem:[%s5548_s1 + $0x6e8] sm:$0xf0]  ;;  %v5307_v21 = vpop.f32.mrf.mxu3  ;;  %v1668_v25 = vadd.f32 %v5167_v4, %v294_v5  ;;  %v3676_v3 = vld [vmem:[%s5548_s1 + $0x734] sm:$0xf] }
  0xca   :  { %2023 = vmatpush.bf16.msra.mxu2 %v3037_v30  ;;  %v2930_v30 = vld [vmem:[%s5548_s1 + $0x498] sm:$0xf0]  ;;  %v3682_v19 = vld [vmem:[%s5548_s1 + $0x764] sm:$0xf]  ;;  %v3290_v20 = vld [vmem:[%s5548_s1 + $0x768] sm:$0xf0] }
  0xcb   :  { %2037 = vmatpush.bf16.msra.mxu3 %v3101_v42  ;;  %v3624_v42 = vld [vmem:[%s5548_s1 + $0x594] sm:$0xf] }
  0xcc   :  { %1996 = vmatpush.bf16.msra.mxu0 %v2901_v51  ;;  %v5240_v51 = vpop.f32.mrf.mxu0  ;;  %v3061_v55 = vor.u32 %v3624_v42, %v3058_v45  ;;  %v3218_v45 = vld [vmem:[%s5548_s1 + $0x6d8] sm:$0xf0] }
  0xcd   :  { %2010 = vmatpush.bf16.msra.mxu1 %v2965_v52  ;;  %v2933_v52 = vor.u32 %v3592_v27, %v2930_v30  ;;  %v3229_v27 = vor.u32 %v3666_v14, %v3226_v18  ;;  %v3648_v30 = vld [vmem:[%s5548_s1 + $0x654] sm:$0xf]  ;;  %v1670_v57 = vadd.f32 %v5240_v51, %v294_v5  ;;  %v3266_v5 = vld [vmem:[%s5548_s1 + $0x738] sm:$0xf0] }
  0xce   :  { %2024 = vmatpush.bf16.msra.mxu2 %v3029_v53  ;;  %v2997_v53 = vor.u32 %v3608_v33, %v2994_v34  ;;  %v3154_v33 = vld [vmem:[%s5548_s1 + $0x658] sm:$0xf0]  ;;  %v3664_v34 = vld [vmem:[%s5548_s1 + $0x6d4] sm:$0xf]  ;;  %v3269_v18 = vor.u32 %v3676_v3, %v3266_v5 }
  0xcf   :  { %2038 = vmatpush.bf16.msra.mxu3 %v3093_v47  ;;  %v5251_v47 = vpop.f32.mrf.mxu1 }
  0xd0   :  { %1997 = vmatpush.bf16.msra.mxu0 %v2893_v61  ;;  %v3170_v61 = vld [vmem:[%s5548_s1 + $0x678] sm:$0xf0] }
  0xd1   :  { %2011 = vmatpush.bf16.msra.mxu1 %v2957_v62  ;;  %v3668_v62 = vld [vmem:[%s5548_s1 + $0x6f4] sm:$0xf] }
  0xd2   :  { %2025 = vmatpush.bf16.msra.mxu2 %v3021_v58  ;;  %v2861_v58 = vor.u32 %v3574_v49, %v2858_v39  ;;  %v3282_v49 = vld [vmem:[%s5548_s1 + $0x758] sm:$0xf0] }
  0xd3   :  { %2039 = vmatpush.bf16.msra.mxu3 %v3085_v10  ;;  %v2925_v10 = vor.u32 %v3590_v43, %v2922_v44  ;;  %v3346_v39 = vld [vmem:[%s5548_s1 + $0x7d8] sm:$0xf0]  ;;  %v3221_v43 = vor.u32 %v3664_v34, %v3218_v45  ;;  %v3146_v44 = vld [vmem:[%s5548_s1 + $0x648] sm:$0xf0] }
  0xd4   :  { %1998 = vmatpush.bf16.msra.mxu0 %v2885_v8  ;;  %v3173_v8 = vor.u32 %v3652_v60, %v3170_v61  ;;  %v5316_v26 = vpop.f32.mrf.mxu0  ;;  %v3338_v60 = vld [vmem:[%s5548_s1 + $0x7c8] sm:$0xf0]  ;;  %v3122_v45 = vld [vmem:[%s5548_s1 + $0x618] sm:$0xf0] }
  0xd5   :  { %2012 = vmatpush.bf16.msra.mxu1 %v2949_v9  ;;  %v3237_v9 = vor.u32 %v3668_v62, %v3234_v63  ;;  %v5377_v63 = vpop.f32.mrf.mxu3 }
  0xd6   :  { %2026 = vmatpush.bf16.msra.mxu2 %v3013_v11  ;;  %v3301_v11 = vor.u32 %v3684_v0, %v3298_v1  ;;  %v3644_v1 = vld [vmem:[%s5548_s1 + $0x634] sm:$0xf] }
  0xd7   :  { %2040 = vmatpush.bf16.msra.mxu3 %v3077_v15  ;;  %v5296_v15 = vpop.f32.mrf.mxu2  ;;  %v5327_v42 = vpop.f32.mrf.mxu1 }
  0xd8   :  { %1999 = vmatpush.bf16.msra.mxu0 %v2877_v22  ;;  %v3698_v22 = vld [vmem:[%s5548_s1 + $0x7e4] sm:$0xf] }
  0xd9   :  { %2013 = vmatpush.bf16.msra.mxu1 %v2941_v23  ;;  %v3354_v23 = vld [vmem:[%s5548_s1 + $0x7e8] sm:$0xf0] }
  0xda   :  { %2027 = vmatpush.bf16.msra.mxu2 %v3005_v24  ;;  %v3165_v24 = vor.u32 %v3650_v12, %v3162_v13  ;;  %v3357_v4 = vor.u32 %v3698_v22, %v3354_v23  ;;  %v3674_v23 = vld [vmem:[%s5548_s1 + $0x724] sm:$0xf] }
  0xdb   :  { %2041 = vmatpush.bf16.msra.mxu3 %v3069_v29  ;;  %v3293_v29 = vor.u32 %v3682_v19, %v3290_v20  ;;  %v3130_v19 = vld [vmem:[%s5548_s1 + $0x628] sm:$0xf0]  ;;  %v3658_v20 = vld [vmem:[%s5548_s1 + $0x6a4] sm:$0xf] }
  0xdc   :  { %2000 = vmatpush.bf16.msra.mxu0 %v2869_v48  ;;  %v3680_v48 = vld [vmem:[%s5548_s1 + $0x754] sm:$0xf] }
  0xdd   :  { %2014 = vmatpush.bf16.msra.mxu1 %v2933_v52  ;;  %v3157_v52 = vor.u32 %v3648_v30, %v3154_v33 }
  0xde   :  { %2028 = vmatpush.bf16.msra.mxu2 %v2997_v53  ;;  %v1682_v53 = vadd.f32 %v5175_v7, %v1668_v25  ;;  %v3210_v7 = vld [vmem:[%s5548_s1 + $0x6c8] sm:$0xf0] }
  0xdf   :  { %2042 = vmatpush.bf16.msra.mxu3 %v3061_v55  ;;  %v3678_v55 = vld [vmem:[%s5548_s1 + $0x744] sm:$0xf]  ;;  %v5374_v61 = vpop.f32.mrf.mxu2  ;;  %v5404_v12 = vpop.f32.mrf.mxu1 }
  0xe0   :  { %2001 = vmatpush.bf16.msra.mxu0 %v2861_v58  ;;  %v1696_v58 = vadd.f32 %v5210_v28, %v1682_v53  ;;  %v3277_v51 = vor.u32 %v3678_v55, %v3274_v56  ;;  %v3341_v28 = vor.u32 %v3694_v59, %v3338_v60  ;;  %v3654_v59 = vld [vmem:[%s5548_s1 + $0x684] sm:$0xf] }
  0xe1   :  { %2015 = vmatpush.bf16.msra.mxu1 %v2925_v10  ;;  %v3138_v10 = vld [vmem:[%s5548_s1 + $0x638] sm:$0xf0] }
  0xe2   :  { %2029 = vmatpush.bf16.msra.mxu2 %v2989_v17  ;;  %v3660_v17 = vld [vmem:[%s5548_s1 + $0x6b4] sm:$0xf]  ;;  %v3141_v13 = vor.u32 %v3644_v1, %v3138_v10  ;;  %v1710_v14 = vadd.f32 %v5221_v37, %v1696_v58  ;;  %v3194_v37 = vld [vmem:[%s5548_s1 + $0x6a8] sm:$0xf0] }
  0xe3   :  { %2043 = vmatpush.bf16.msra.mxu3 %v3053_v6  ;;  %2002 = vmatmul.bf16.vlgmr.msra.gmra.mxu0 %v4454_v31  ;;  %v3696_v31 = vld [vmem:[%s5548_s1 + $0x7d4] sm:$0xf]  ;;  %v1684_v6 = vadd.f32 %v5251_v47, %v1670_v57  ;;  %v3642_v47 = vld [vmem:[%s5548_s1 + $0x624] sm:$0xf]  ;;  %v3197_v34 = vor.u32 %v3658_v20, %v3194_v37  ;;  %v3114_v57 = vld [vmem:[%s5548_s1 + $0x608] sm:$0xf0] }
  0xe4   :  { %2050 = vmatpush.bf16.msrb.mxu0 %v3173_v8  ;;  %2016 = vmatmul.bf16.vlgmr.msra.gmra.mxu1 %v4467_v36  ;;  %v3646_v36 = vld [vmem:[%s5548_s1 + $0x644] sm:$0xf]  ;;  %v3349_v54 = vor.u32 %v3696_v31, %v3346_v39  ;;  %v1725_v8 = vpop.f32.mrf.mxu0  ;;  %v3133_v30 = vor.u32 %v3642_v47, %v3130_v19  ;;  %v1724_v33 = vadd.f32 %v5316_v26, %v1710_v14  ;;  %v3186_v26 = vld [vmem:[%s5548_s1 + $0x698] sm:$0xf0]  ;;  %v3672_v39 = vld [vmem:[%s5548_s1 + $0x714] sm:$0xf] }
  0xe5   :  { %2064 = vmatpush.bf16.msrb.mxu1 %v3237_v9  ;;  %2030 = vmatmul.bf16.vlgmr.msra.gmra.mxu2 %v4465_v35  ;;  %v3285_v35 = vor.u32 %v3680_v48, %v3282_v49  ;;  %v3149_v62 = vor.u32 %v3646_v36, %v3146_v44  ;;  %v3692_v9 = vld [vmem:[%s5548_s1 + $0x7b4] sm:$0xf]  ;;  %v1698_v25 = vadd.f32 %v5296_v15, %v1684_v6  ;;  %v3314_v44 = vld [vmem:[%s5548_s1 + $0x798] sm:$0xf0]  ;;  %v3242_v58 = vld [vmem:[%s5548_s1 + $0x708] sm:$0xf0] }
  0xe6   :  { %2078 = vmatpush.bf16.msrb.mxu2 %v3301_v11  ;;  %2044 = vmatmul.bf16.vlgmr.msra.gmra.mxu3 %v4475_v40  ;;  %v3662_v40 = vld [vmem:[%s5548_s1 + $0x6c4] sm:$0xf]  ;;  %v3330_v11 = vld [vmem:[%s5548_s1 + $0x7b8] sm:$0xf0]  ;;  %v3640_v15 = vld [vmem:[%s5548_s1 + $0x614] sm:$0xf] }
  0xe7   :  { %2092 = vmatpush.bf16.msrb.mxu3 %v3365_v16  ;;  %v3213_v0 = vor.u32 %v3662_v40, %v3210_v7  ;;  %v3205_v16 = vor.u32 %v3660_v17, %v3202_v2  ;;  %v3333_v22 = vor.u32 %v3692_v9, %v3330_v11  ;;  %v3656_v48 = vld [vmem:[%s5548_s1 + $0x694] sm:$0xf]  ;;  %v1753_v49 = vpop.f32.mrf.mxu2  ;;  %v1712_v53 = vadd.f32 %v5307_v21, %v1698_v25  ;;  %v1793_v40 = vpop.f32.mrf.mxu1  ;;  %v3638_v21 = vld [vmem:[%s5548_s1 + $0x604] sm:$0xf]  ;;  %v3306_v1 = vld [vmem:[%s5548_s1 + $0x788] sm:$0xf0] }
  0xe8   :  { %2051 = vmatpush.bf16.msrb.mxu0 %v3165_v24  ;;  %v3258_v24 = vld [vmem:[%s5548_s1 + $0x728] sm:$0xf0]  ;;  %v3688_v36 = vld [vmem:[%s5548_s1 + $0x794] sm:$0xf]  ;;  %v1738_v7 = vadd.f32 %v5327_v42, %v1724_v33  ;;  %v3189_v55 = vor.u32 %v3656_v48, %v3186_v26  ;;  %v3117_v10 = vor.u32 %v3638_v21, %v3114_v57  ;;  %v3709_v6 = vld [vmem:[%s5551_s3 + $0x38] sm:$0xff] }
  0xe9   :  { %2065 = vmatpush.bf16.msrb.mxu1 %v3229_v27  ;;  %v3690_v27 = vld [vmem:[%s5548_s1 + $0x7a4] sm:$0xf]  ;;  %v3317_v60 = vor.u32 %v3688_v36, %v3314_v44  ;;  %v3178_v42 = vld [vmem:[%s5548_s1 + $0x688] sm:$0xf0]  ;;  %v3705_v25 = vld [vmem:[%s5551_s3 + $0x18] sm:$0xff] }
  0xea   :  { %2079 = vmatpush.bf16.msrb.mxu2 %v3293_v29  ;;  %v3322_v29 = vld [vmem:[%s5548_s1 + $0x7a8] sm:$0xf0]  ;;  %v1752_v17 = vadd.f32 %v5374_v61, %v1738_v7 }
  0xeb   :  { %2093 = vmatpush.bf16.msrb.mxu3 %v3357_v4  ;;  %v3261_v4 = vor.u32 %v3674_v23, %v3258_v24  ;;  %v3325_v31 = vor.u32 %v3690_v27, %v3322_v29 }
  0xec   :  { %2052 = vmatpush.bf16.msrb.mxu0 %v3157_v52  ;;  %v3250_v52 = vld [vmem:[%s5548_s1 + $0x718] sm:$0xf0]  ;;  %v1766_v11 = vadd.f32 %v5377_v63, %v1752_v17  ;;  %v3707_v63 = vld [vmem:[%s5551_s3 + $0x28] sm:$0xff] }
  0xed   :  { %2066 = vmatpush.bf16.msrb.mxu1 %v3221_v43  ;;  %v1767_v43 = vpop.f32.mrf.mxu3  ;;  %v3253_v56 = vor.u32 %v3672_v39, %v3250_v52 }
  0xee   :  { %2080 = vmatpush.bf16.msrb.mxu2 %v3285_v35  ;;  %v1779_v35 = vpop.f32.mrf.mxu0 }
  0xef   :  { %2094 = vmatpush.bf16.msrb.mxu3 %v3349_v54  ;;  %v3125_v54 = vor.u32 %v3640_v15, %v3122_v45  ;;  %v1807_v3 = vpop.f32.mrf.mxu2  ;;  %v1795_v61 = vpop.f32.mrf.mxu1 }
  0xf0   :  { %2053 = vmatpush.bf16.msrb.mxu0 %v3149_v62  ;;  %v3670_v62 = vld [vmem:[%s5548_s1 + $0x704] sm:$0xf] }
  0xf1   :  { %2067 = vmatpush.bf16.msrb.mxu1 %v3213_v0  ;;  %v1726_v0 = vadd.f32 %v1725_v8, %v1712_v53  ;;  %v3245_v2 = vor.u32 %v3670_v62, %v3242_v58  ;;  %v295_v62 = vperm.slane %v5238_v50, 1 }
  0xf2   :  { %2081 = vmatpush.bf16.msrb.mxu2 %v3277_v51  ;;  %v3686_v51 = vld [vmem:[%s5548_s1 + $0x784] sm:$0xf] }
  0xf3   :  { %2095 = vmatpush.bf16.msrb.mxu3 %v3341_v28  ;;  %v3181_v28 = vor.u32 %v3654_v59, %v3178_v42  ;;  %v3309_v5 = vor.u32 %v3686_v51, %v3306_v1  ;;  %v1740_v8 = vadd.f32 %v5404_v12, %v1726_v0  ;;  %v3716_v42 = vld [vmem:[%s5551_s3 + $0x70] sm:$0xff] }
  0xf4   :  { %2054 = vmatpush.bf16.msrb.mxu0 %v3141_v13 }
  0xf5   :  { %2068 = vmatpush.bf16.msrb.mxu1 %v3205_v16  ;;  %v1821_v9 = vpop.f32.mrf.mxu3  ;;  %v1754_v13 = vadd.f32 %v1753_v49, %v1740_v8  ;;  %v3708_v16 = vld [vmem:[%s5551_s3 + $0x30] sm:$0xff] }
  0xf6   :  { %2082 = vmatpush.bf16.msrb.mxu2 %v3269_v18  ;;  %v1781_v14 = vpop.f32.mrf.mxu0  ;;  %v1780_v18 = vadd.f32 %v1779_v35, %v1766_v11  ;;  %v3702_v35 = vld [vmem:[%s5551_s3] sm:$0xff] }
  0xf7   :  { %2096 = vmatpush.bf16.msrb.mxu3 %v3333_v22  ;;  %v1768_v12 = vadd.f32 %v1767_v43, %v1754_v13  ;;  %v1809_v20 = vpop.f32.mrf.mxu2  ;;  %v3713_v13 = vld [vmem:[%s5551_s3 + $0x58] sm:$0xff] }
  0xf8   :  { %2055 = vmatpush.bf16.msrb.mxu0 %v3133_v30  ;;  %v1794_v47 = vadd.f32 %v1793_v40, %v1780_v18  ;;  %v3712_v18 = vld [vmem:[%s5551_s3 + $0x50] sm:$0xff] }
  0xf9   :  { %2069 = vmatpush.bf16.msrb.mxu1 %v3197_v34  ;;  %v1782_v19 = vadd.f32 %v1781_v14, %v1768_v12 }
  0xfa   :  { %2083 = vmatpush.bf16.msrb.mxu2 %v3261_v4  ;;  %v1808_v22 = vadd.f32 %v1807_v3, %v1794_v47  ;;  %v3704_v4 = vld [vmem:[%s5551_s3 + $0x10] sm:$0xff] }
  0xfb   :  { %2097 = vmatpush.bf16.msrb.mxu3 %v3325_v31  ;;  %v3703_v31 = vld [vmem:[%s5551_s3 + $0x8] sm:$0xff] }
  0xfc   :  { %2056 = vmatpush.bf16.msrb.mxu0 %v3125_v54  ;;  %v1822_v24 = vadd.f32 %v1821_v9, %v1808_v22  ;;  %v3711_v22 = vld [vmem:[%s5551_s3 + $0x48] sm:$0xff] }
  0xfd   :  { %2070 = vmatpush.bf16.msrb.mxu1 %v3189_v55  ;;  %v1823_v37 = vpop.f32.mrf.mxu3 }
  0xfe   :  { %2084 = vmatpush.bf16.msrb.mxu2 %v3253_v56 }
  0xff   :  { %2098 = vmatpush.bf16.msrb.mxu3 %v3317_v60  ;;  %v3717_v60 = vld [vmem:[%s5551_s3 + $0x78] sm:$0xff] }
 0x100   :  { %2057 = vmatpush.bf16.msrb.mxu0 %v3117_v10  ;;  %v1835_v23 = vpop.f32.mrf.mxu0 }
 0x101   :  { %2071 = vmatpush.bf16.msrb.mxu1 %v3181_v28  ;;  %v1836_v27 = vadd.f32 %v1835_v23, %v1822_v24  ;;  %v3715_v28 = vld [vmem:[%s5551_s3 + $0x68] sm:$0xff] }
 0x102   :  { %2085 = vmatpush.bf16.msrb.mxu2 %v3245_v2 }
 0x103   :  { %2099 = vmatpush.bf16.msrb.mxu3 %v3309_v5  ;;  %2058 = vmatmul.bf16.vlgmr.msrb.gmra.mxu0 %v4682_v32  ;;  %v1849_v32 = vpop.f32.mrf.mxu1  ;;  %v3714_v5 = vld [vmem:[%s5551_s3 + $0x60] sm:$0xff] }
 0x104   :  { %2244 = vmatpush.bf16.msra.mxu0 %v3709_v6  ;;  %2072 = vmatmul.bf16.vlgmr.msrb.gmra.mxu1 %v4695_v41  ;;  %v1796_v41 = vadd.f32 %v1795_v61, %v1782_v19  ;;  %v1850_v15 = vadd.f32 %v1849_v32, %v1836_v27 }
 0x105   :  { %2086 = vmatmul.bf16.vlgmr.msrb.gmra.mxu2 %v4693_v38  ;;  %v3706_v38 = vld [vmem:[%s5551_s3 + $0x20] sm:$0xff]  ;;  %2258 = vmatpush.bf16.msra.mxu1 %v3717_v60 }
 0x106   :  { %2100 = vmatmul.bf16.vlgmr.msrb.gmra.mxu3 %v4703_v46  ;;  %v1810_v46 = vadd.f32 %v1809_v20, %v1796_v41 }
 0x108   :  { %2245 = vmatpush.bf16.msra.mxu0 %v3708_v16  ;;  %v1863_v29 = vpop.f32.mrf.mxu2  ;;  %v1824_v30 = vadd.f32 %v1823_v37, %v1810_v46  ;;  %v1837_v33 = vpop.f32.mrf.mxu0 }
 0x109   :  { %v1877_v34 = vpop.f32.mrf.mxu3  ;;  %v1864_v49 = vadd.f32 %v1863_v29, %v1850_v15  ;;  %2259 = vmatpush.bf16.msra.mxu1 %v3716_v42 }
 0x10a   :  { %v1838_v45 = vadd.f32 %v1837_v33, %v1824_v30 }
 0x10b   :  { %v1851_v48 = vpop.f32.mrf.mxu1  ;;  %v1878_v52 = vadd.f32 %v1877_v34, %v1864_v49 }
 0x10c   :  { %2246 = vmatpush.bf16.msra.mxu0 %v3707_v63  ;;  %v1852_v26 = vadd.f32 %v1851_v48, %v1838_v45 }
 0x10d   :  { %v2106_v44 = vmax.f32 %v1878_v52, 0.0  ;;  %2260 = vmatpush.bf16.msra.mxu1 %v3715_v28 }
 0x110   :  { %2247 = vmatpush.bf16.msra.mxu0 %v3706_v38  ;;  %v1865_v39 = vpop.f32.mrf.mxu2  ;;  %v3710_v38 = vld [vmem:[%s5551_s3 + $0x40] sm:$0xff] }
 0x111   :  { %v1866_v53 = vadd.f32 %v1865_v39, %v1852_v26  ;;  %v1879_v43 = vpop.f32.mrf.mxu3  ;;  %2261 = vmatpush.bf16.msra.mxu1 %v3714_v5 }
 0x113   :  { %v1880_v36 = vadd.f32 %v1879_v43, %v1866_v53 }
 0x114   :  { %2248 = vmatpush.bf16.msra.mxu0 %v3705_v25 }
 0x115   :  { %v2108_v40 = vmax.f32 %v1880_v36, 0.0  ;;  %2262 = vmatpush.bf16.msra.mxu1 %v3713_v13 }
 0x117   :  { %v2110_v54 = vpack.c.bf16 %v2108_v40, %v2106_v44 }
 0x118   :  { %2249 = vmatpush.bf16.msra.mxu0 %v3704_v4 }
 0x119   :  { %2263 = vmatpush.bf16.msra.mxu1 %v3712_v18 }
 0x11c   :  { %2250 = vmatpush.bf16.msra.mxu0 %v3703_v31 }
 0x11d   :  { %2264 = vmatpush.bf16.msra.mxu1 %v3711_v22 }
 0x120   :  { %2251 = vmatpush.bf16.msra.mxu0 %v3702_v35  ;;  %v1891_v7 = vpop.f32.mrf.mxu0 }
 0x121   :  { %v1905_v55 = vpop.f32.mrf.mxu1  ;;  %v1892_v51 = vadd.f32 %v1891_v7, %v295_v62  ;;  %2265 = vmatpush.bf16.msra.mxu1 %v3710_v38 }
 0x123   :  { %2252 = vmatmul.bf16.vlgmr.msra.gmra.mxu0 %v2110_v54  ;;  %v1906_v17 = vadd.f32 %v1905_v55, %v1892_v51 }
 0x128   :  { %v1919_v56 = vpop.f32.mrf.mxu2  ;;  %v1893_v57 = vpop.f32.mrf.mxu0 }
 0x129   :  { %v1933_v21 = vpop.f32.mrf.mxu3  ;;  %v1907_v59 = vpop.f32.mrf.mxu1  ;;  %v1894_v2 = vadd.f32 %v1893_v57, %v295_v62  ;;  %v1920_v6 = vadd.f32 %v1919_v56, %v1906_v17 }
 0x12b   :  { %v1908_v8 = vadd.f32 %v1907_v59, %v1894_v2  ;;  %v1934_v11 = vadd.f32 %v1933_v21, %v1920_v6 }
 0x130   :  { %v1921_v58 = vpop.f32.mrf.mxu2 }
 0x131   :  { %v1935_v0 = vpop.f32.mrf.mxu3  ;;  %v1922_v61 = vadd.f32 %v1921_v58, %v1908_v8 }
 0x133   :  { %v1936_v63 = vadd.f32 %v1935_v0, %v1922_v61 }
 0x140   :  { %v1947_v1 = vpop.f32.mrf.mxu0 }
 0x141   :  { %v1961_v10 = vpop.f32.mrf.mxu1  ;;  %v1948_v16 = vadd.f32 %v1947_v1, %v1934_v11 }
 0x143   :  { %v1962_v20 = vadd.f32 %v1961_v10, %v1948_v16  ;;  %v3718_v10 = vld [vmem:[%s5552_s4] ss:$0 sm:$0xff] }
 0x148   :  { %v1975_v3 = vpop.f32.mrf.mxu2  ;;  %v1949_v9 = vpop.f32.mrf.mxu0 }
 0x149   :  { %v1989_v50 = vpop.f32.mrf.mxu3  ;;  %v1963_v14 = vpop.f32.mrf.mxu1  ;;  %v1950_v23 = vadd.f32 %v1949_v9, %v1936_v63  ;;  %v1976_v32 = vadd.f32 %v1975_v3, %v1962_v20 }
 0x14b   :  { %v1964_v24 = vadd.f32 %v1963_v14, %v1950_v23  ;;  %v1990_v25 = vadd.f32 %v1989_v50, %v1976_v32 }
 0x150   :  { %v1977_v12 = vpop.f32.mrf.mxu2 }
 0x151   :  { %v1991_v47 = vpop.f32.mrf.mxu3  ;;  %v1978_v27 = vadd.f32 %v1977_v12, %v1964_v24 }
 0x153   :  { %v1992_v34 = vadd.f32 %v1991_v47, %v1978_v27 }
 0x160   :  { %v2003_v19 = vpop.f32.mrf.mxu0 }
 0x161   :  { %v2017_v37 = vpop.f32.mrf.mxu1  ;;  %v2004_v30 = vadd.f32 %v2003_v19, %v1990_v25 }
 0x163   :  { %v2018_v4 = vadd.f32 %v2017_v37, %v2004_v30 }
 0x168   :  { %v2031_v41 = vpop.f32.mrf.mxu2  ;;  %v2005_v29 = vpop.f32.mrf.mxu0 }
 0x169   :  { %v2045_v46 = vpop.f32.mrf.mxu3  ;;  %v2019_v33 = vpop.f32.mrf.mxu1  ;;  %v2006_v15 = vadd.f32 %v2005_v29, %v1992_v34  ;;  %v2032_v48 = vadd.f32 %v2031_v41, %v2018_v4 }
 0x16b   :  { %v2020_v26 = vadd.f32 %v2019_v33, %v2006_v15  ;;  %v2046_v52 = vadd.f32 %v2045_v46, %v2032_v48 }
 0x170   :  { %v2033_v45 = vpop.f32.mrf.mxu2 }
 0x171   :  { %v2047_v49 = vpop.f32.mrf.mxu3  ;;  %v2034_v53 = vadd.f32 %v2033_v45, %v2020_v26 }
 0x173   :  { %v2048_v36 = vadd.f32 %v2047_v49, %v2034_v53 }
 0x180   :  { %v2059_v31 = vpop.f32.mrf.mxu0 }
 0x181   :  { %v2073_v39 = vpop.f32.mrf.mxu1  ;;  %v2060_v43 = vadd.f32 %v2059_v31, %v2046_v52 }
 0x183   :  { %v2074_v54 = vadd.f32 %v2073_v39, %v2060_v43 }
 0x188   :  { %v2087_v35 = vpop.f32.mrf.mxu2  ;;  %v2061_v40 = vpop.f32.mrf.mxu0 }
 0x189   :  { %v2101_v44 = vpop.f32.mrf.mxu3  ;;  %v2062_v7 = vadd.f32 %v2061_v40, %v2048_v36  ;;  %v2088_v55 = vadd.f32 %v2087_v35, %v2074_v54  ;;  %v2075_v56 = vpop.f32.mrf.mxu1 }
 0x18b   :  { %v2076_v21 = vadd.f32 %v2075_v56, %v2062_v7  ;;  %v2102_v59 = vadd.f32 %v2101_v44, %v2088_v55 }
 0x18d   :  { %v2107_v58 = vmax.f32 %v2102_v59, 0.0 }
 0x190   :  { %v2089_v57 = vpop.f32.mrf.mxu2 }
 0x191   :  { %v2090_v60 = vadd.f32 %v2089_v57, %v2076_v21  ;;  %v2103_v42 = vpop.f32.mrf.mxu3 }
 0x193   :  { %v2104_v62 = vadd.f32 %v2103_v42, %v2090_v60 }
 0x195   :  { %v2109_v0 = vmax.f32 %v2104_v62, 0.0 }
 0x197   :  { %v2111_v51 = vpack.c.bf16 %v2109_v0, %v2107_v58 }
 0x199   :  { %2266 = vmatmul.bf16.vlgmr.msra.gmra.mxu1 %v2111_v51 }
 0x1a0   :  { %v2253_v1 = vpop.f32.mrf.mxu0 }
 0x1a1   :  { %v2254_v17 = vadd.f32 %v3718_v10, %v2253_v1 }
 0x1a8   :  { %v2255_v3 = vpop.f32.mrf.mxu0 }
 0x1a9   :  { %v2256_v5 = vadd.f32 %v3718_v10, %v2255_v3 }
 0x216   :  { %v2267_v28 = vpop.f32.mrf.mxu1 }
 0x217   :  { %v2268_v2 = vadd.f32 %v2267_v28, %v2254_v17 }
 0x219   :  { %2272 = vst [vmem:[%s5553_s5] sm:$0xff] %v2268_v2 }
 0x21e   :  { %v2269_v6 = vpop.f32.mrf.mxu1 }
 0x21f   :  { %v2270_v50 = vadd.f32 %v2269_v6, %v2256_v5 }
 0x221   :  { %2273 = vst [vmem:[%s5553_s5 + $0x8] sm:$0xff] %v2270_v50 }

</bundles_post_ra>
